<compile_context>
chip_gen: v5e
topology: v5e:2x2
jax: 0.10.0
libtpu: 0.0.40
codegen_flags: <defaults>
</compile_context>

<pallas_src>
import jax
import jax.numpy as jnp
from jax.experimental import pallas as pl
from jax.experimental.pallas import tpu as pltpu


def _round_up(x, m):
    return (x + m - 1) // m * m


# ----------------------------------------------------------------------------
# Pallas kernel: tiled matmul + fused BatchNorm affine + PReLU epilogue.
# Accumulates directly into the resident f32 output block (out index_map is
# independent of k), epilogue applied in-place at the last k step.
# ----------------------------------------------------------------------------
def _make_kernel(use_prelu):
    def kernel(x_ref, w_ref, s_ref, b_ref, a_ref, o_ref):
        k = pl.program_id(2)

        @pl.when(k == 0)
        def _():
            o_ref[...] = jnp.zeros_like(o_ref)

        # bf16 x bf16 -> f32 accumulate (native MXU path on v6e/v7x).
        o_ref[...] += jnp.dot(
            x_ref[...], w_ref[...], preferred_element_type=jnp.float32
        )

        @pl.when(k == pl.num_programs(2) - 1)
        def _():
            # Epilogue kept in f32 (v5e has no bf16 VPU path; runs once).
            y = o_ref[...] * s_ref[...] + b_ref[...]
            if use_prelu:
                y = jnp.where(y >= 0.0, y, a_ref[...] * y)
            o_ref[...] = y

    return kernel


# ----------------------------------------------------------------------------
# Tiling plan + parameter pre-padding (done once at init).
# ----------------------------------------------------------------------------
_TM_MAX = 256
_TN_MAX = 512
_W_TILE_BYTES = 4 * 1024 * 1024  # per-buffer bf16 weight tile budget


def _plan_kn(K, N):
    """Choose (tk, tn) / padded (Kp, Np) for fixed per-layer K, N."""
    Np = _round_up(N, 128)
    tn = min(Np, _TN_MAX)
    Np = _round_up(Np, tn)
    # Keep one bf16 weight tile <= _W_TILE_BYTES -> big tiles, few grid steps,
    # but 2*(x+w)+out stays well under 32MiB scoped VMEM (v7x: 64MiB physical).
    tk_max = max(512, (_W_TILE_BYTES // (2 * tn)) // 128 * 128)
    Kp = _round_up(K, 128)
    nk = -(-Kp // tk_max)                      # ceil
    tk = _round_up(-(-Kp // nk), 128)
    Kp = tk * nk
    return dict(Np=Np, tn=tn, Kp=Kp, tk=tk, nk=nk)


def prepare_conv_params(w, scale, shift, alpha):
    """Pre-pad + pre-cast (w, scale, shift, alpha) once; record tiling plan."""
    K, N = w.shape
    plan = _plan_kn(K, N)
    Kp, Np = plan["Kp"], plan["Np"]
    return dict(
        K=K, N=N, plan=plan,
        w=jnp.pad(w, ((0, Kp - K), (0, Np - N))).astype(jnp.bfloat16),
        scale=jnp.pad(scale, ((0, Np - N),)).reshape(1, Np).astype(jnp.float32),
        shift=jnp.pad(shift, ((0, Np - N),)).reshape(1, Np).astype(jnp.float32),
        alpha=jnp.pad(alpha, ((0, Np - N),)).reshape(1, Np).astype(jnp.float32),
    )


# ----------------------------------------------------------------------------
# Fused matmul + BN + PReLU via pallas_call
# ----------------------------------------------------------------------------
def fused_matmul_bn_prelu(x_bf16, layer, use_prelu):
    """(M, K) bf16 x pre-padded (Kp, Np) bf16 weight -> (M, N) f32."""
    M = x_bf16.shape[0]
    K, N = layer["K"], layer["N"]
    plan = layer["plan"]
    Kp, Np = plan["Kp"], plan["Np"]
    tk, tn, nk = plan["tk"], plan["tn"], plan["nk"]

    Mp = _round_up(M, 8)
    tm = min(Mp, _TM_MAX)
    Mp = _round_up(Mp, tm)

    xp = jnp.pad(x_bf16, ((0, Mp - M), (0, Kp - K)))

    grid = (Mp // tm, Np // tn, nk)
    out = pl.pallas_call(
        _make_kernel(use_prelu),
        out_shape=jax.ShapeDtypeStruct((Mp, Np), jnp.float32),
        grid_spec=pltpu.PrefetchScalarGridSpec(
            num_scalar_prefetch=0,
            grid=grid,
            in_specs=[
                pl.BlockSpec((tm, tk), lambda i, j, k: (i, k)),
                pl.BlockSpec((tk, tn), lambda i, j, k: (k, j)),
                pl.BlockSpec((1, tn), lambda i, j, k: (0, j)),
                pl.BlockSpec((1, tn), lambda i, j, k: (0, j)),
                pl.BlockSpec((1, tn), lambda i, j, k: (0, j)),
            ],
            out_specs=pl.BlockSpec((tm, tn), lambda i, j, k: (i, j)),
        ),
        compiler_params=pltpu.CompilerParams(
            dimension_semantics=("parallel", "parallel", "arbitrary"),
            vmem_limit_bytes=32 * 1024 * 1024,
        ),
    )(xp, layer["w"], layer["scale"], layer["shift"], layer["alpha"])
    return out[:M, :N]


# ----------------------------------------------------------------------------
# Glue: im2col, ConvBNRelu application, 1x1 conv, bilinear upsample
# ----------------------------------------------------------------------------
def im2col_3x3(x):
    """NHWC (B,H,W,C) -> (B,H,W,9C) for a 3x3 conv with padding=1, stride=1."""
    B, H, W, C = x.shape
    xp = jnp.pad(x, ((0, 0), (1, 1), (1, 1), (0, 0)))
    cols = [xp[:, dy:dy + H, dx:dx + W, :] for dy in range(3) for dx in range(3)]
    return jnp.concatenate(cols, axis=-1)


def conv_bn_prelu(x, layer, use_prelu=True):
    """3x3 stride-1 pad-1 Conv + inference BN + PReLU via the Pallas kernel."""
    # TODO(synk): at realistic (>=128x128) resolutions, replace materialized
    # im2col with in-kernel shifted-window taps to cut activation HBM ~9x.
    B, H, W, C = x.shape
    cols = im2col_3x3(x.astype(jnp.bfloat16))
    flat = cols.reshape(B * H * W, 9 * C)
    out = fused_matmul_bn_prelu(flat, layer, use_prelu)
    return out.reshape(B, H, W, layer["N"])


def conv1x1(x, w):
    """Final 1x1 conv (Cin=32 -> Cout=1, no BN/act): trivially small, so it is
    left to XLA instead of padding N=1->128 / K=32->128 onto the MXU."""
    return jnp.einsum("bhwc,cn->bhwn", x, w)


def upsample_bilinear(x, size):
    """nn.functional.interpolate(mode='bilinear', align_corners=False)."""
    B, H, W, C = x.shape
    return jax.image.resize(x, (B, size[0], size[1], C), method="bilinear")


# ----------------------------------------------------------------------------
# Deterministic parameter initialisation (matching module __init__ shapes)
# ----------------------------------------------------------------------------
def init_convbnrelu(key, cin, cout, eps=1e-5):
    kw, kg, kb, km, kv = jax.random.split(key, 5)
    fan_in = 9 * cin
    w = jax.random.normal(kw, (3, 3, cin, cout), jnp.float32)
    w = (w / (fan_in ** 0.5)).reshape(fan_in, cout)  # (kh,kw,cin) flattened
    gamma = 1.0 + 0.1 * jax.random.normal(kg, (cout,), jnp.float32)
    beta = 0.1 * jax.random.normal(kb, (cout,), jnp.float32)
    mean = 0.1 * jax.random.normal(km, (cout,), jnp.float32)
    var = jnp.abs(1.0 + 0.1 * jax.random.normal(kv, (cout,), jnp.float32))
    scale = gamma / jnp.sqrt(var + eps)
    shift = beta - mean * scale
    alpha = jnp.full((cout,), 0.25, jnp.float32)  # nn.PReLU() default init
    return prepare_conv_params(w, scale, shift, alpha)


def init_tris_params(key):
    ks = jax.random.split(key, 12)
    v_chans = [256, 512, 1024, 2048]
    return {
        "reduced_c1": init_convbnrelu(ks[0], v_chans[0], 64),
        "reduced_c2": init_convbnrelu(ks[1], v_chans[1], 128),
        "reduced_c3": init_convbnrelu(ks[2], v_chans[2], 256),
        "reduced_c4": init_convbnrelu(ks[3], v_chans[3], 512),
        "output4": init_convbnrelu(ks[4], 512, 256),
        "output3": init_convbnrelu(ks[5], 256, 128),
        "output2": init_convbnrelu(ks[6], 128, 64),
        "output1": init_convbnrelu(ks[7], 64, 32),
        "final_seg1_0": init_convbnrelu(ks[8], 32, 32),
        "final_seg1_1": jax.random.normal(ks[9], (32, 1), jnp.float32) / (32 ** 0.5),
    }


# ----------------------------------------------------------------------------
# TRIS forward (inference path -> seg_final_out1 only)
# ----------------------------------------------------------------------------
def tris_forward(params, c1, c2, c3, c4, img_size):
    # TODO(synk): attention_i(c_i, lan) residual omitted (PixelAttention source
    # unavailable); fuse_feats_i == c_i here.
    fuse2, fuse3, fuse4 = c2, c3, c4

    dem1 = conv_bn_prelu(c1, params["reduced_c1"])
    dem2 = conv_bn_prelu(fuse2, params["reduced_c2"])
    dem3 = conv_bn_prelu(fuse3, params["reduced_c3"])
    dem4 = conv_bn_prelu(fuse4, params["reduced_c4"])

    seg_out4 = upsample_bilinear(conv_bn_prelu(dem4, params["output4"]),
                                 dem3.shape[1:3])
    seg_out3 = upsample_bilinear(conv_bn_prelu(seg_out4 + dem3, params["output3"]),
                                 dem2.shape[1:3])
    seg_out2 = upsample_bilinear(conv_bn_prelu(seg_out3 + dem2, params["output2"]),
                                 dem1.shape[1:3])
    seg_out1 = conv_bn_prelu(seg_out2 + dem1, params["output1"])

    x = conv_bn_prelu(seg_out1, params["final_seg1_0"])
    x = conv1x1(x, params["final_seg1_1"])
    seg_final_out1 = upsample_bilinear(x, img_size)

    # Return in NCHW to match the PyTorch module's output convention.
    return jnp.transpose(seg_final_out1, (0, 3, 1, 2))


# ----------------------------------------------------------------------------
if __name__ == "__main__":
    key = jax.random.PRNGKey(0)
    kp, k1, k2, k3, k4 = jax.random.split(key, 5)

    params = init_tris_params(kp)

    B = 2
    img_size = (32, 32)  # image H,W -> strides 4/8/16/32 give the c1..c4 grids
    # Synthetic CLIP-RN50 pyramid features (NHWC), per-__init__ channel counts.
    c1 = jax.random.normal(k1, (B, 8, 8, 256), jnp.float32)
    c2 = jax.random.normal(k2, (B, 4, 4, 512), jnp.float32)
    c3 = jax.random.normal(k3, (B, 2, 2, 1024), jnp.float32)
    c4 = jax.random.normal(k4, (B, 1, 1, 2048), jnp.float32)

    out = tris_forward(params, c1, c2, c3, c4, img_size)
    out = jax.block_until_ready(out)
    assert out.shape == (B, 1, img_size[0], img_size[1]), out.shape
    print("KERNEL_OK")
</pallas_src>

<mosaic_0001>
module attributes {stable_mosaic.version = 11 : i64} {
  func.func @kernel(%arg0: i32, %arg1: i32, %arg2: i32, %arg3: memref<128x2304xbf16, #tpu.memory_space<vmem>>, %arg4: memref<2304x128xbf16, #tpu.memory_space<vmem>>, %arg5: memref<1x128xf32, #tpu.memory_space<vmem>>, %arg6: memref<1x128xf32, #tpu.memory_space<vmem>>, %arg7: memref<1x128xf32, #tpu.memory_space<vmem>>, %arg8: memref<128x128xf32, #tpu.memory_space<vmem>>) attributes {dimension_semantics = [#tpu.dimension_semantics<parallel>, #tpu.dimension_semantics<parallel>, #tpu.dimension_semantics<arbitrary>], iteration_bounds = array<i64: 1, 1, 1>, scalar_prefetch = 0 : i64, scratch_operands = 0 : i64, tpu.core_type = #tpu.core_type<tc>, window_params = [{transform_indices = @transform_0, window_bounds = array<i64: 128, 2304>}, {transform_indices = @transform_1, window_bounds = array<i64: 2304, 128>}, {transform_indices = @transform_2, window_bounds = array<i64: 1, 128>}, {transform_indices = @transform_3, window_bounds = array<i64: 1, 128>}, {transform_indices = @transform_4, window_bounds = array<i64: 1, 128>}, {transform_indices = @transform_5, window_bounds = array<i64: 128, 128>}]} {
    %c0_i32 = arith.constant 0 : i32
    %0 = arith.cmpi eq, %arg2, %c0_i32 : i32
    %1 = arith.extui %0 : i1 to i32
    %c0_i32_0 = arith.constant 0 : i32
    %2 = arith.cmpi ne, %1, %c0_i32_0 : i32
    scf.if %2 {
      %cst_10 = arith.constant 0.000000e+00 : f32
      %12 = vector.broadcast %cst_10 : f32 to vector<128x128xf32>
      %c0_11 = arith.constant 0 : index
      %c0_12 = arith.constant 0 : index
      %13 = vector.load %arg8[%c0_11, %c0_12] : memref<128x128xf32, #tpu.memory_space<vmem>>, vector<128x128xf32>
      tpu.vector_store %arg8[%c0_11, %c0_12], %12 {strides = array<i32>} : memref<128x128xf32, #tpu.memory_space<vmem>>, vector<128x128xf32>,
    } else {
    }
    %c0 = arith.constant 0 : index
    %c0_1 = arith.constant 0 : index
    %3 = vector.load %arg8[%c0, %c0_1] : memref<128x128xf32, #tpu.memory_space<vmem>>, vector<128x128xf32>
    %c0_2 = arith.constant 0 : index
    %c0_3 = arith.constant 0 : index
    %4 = vector.load %arg3[%c0_2, %c0_3] : memref<128x2304xbf16, #tpu.memory_space<vmem>>, vector<128x2304xbf16>
    %c0_4 = arith.constant 0 : index
    %c0_5 = arith.constant 0 : index
    %5 = vector.load %arg4[%c0_4, %c0_5] : memref<2304x128xbf16, #tpu.memory_space<vmem>>, vector<2304x128xbf16>
    %cst = arith.constant dense<0.000000e+00> : vector<128x128xf32>
    %6 = tpu.matmul %4, %5, %cst {dimension_numbers = #tpu.dot_dimension_numbers<[1], [0], [0], [1], [0, 0, 1, 1], [], []>} : vector<128x2304xbf16>, vector<2304x128xbf16>, vector<128x128xf32> -> vector<128x128xf32>
    %7 = arith.addf %3, %6 : vector<128x128xf32>
    %c0_6 = arith.constant 0 : index
    %c0_7 = arith.constant 0 : index
    %8 = vector.load %arg8[%c0_6, %c0_7] : memref<128x128xf32, #tpu.memory_space<vmem>>, vector<128x128xf32>
    tpu.vector_store %arg8[%c0_6, %c0_7], %7 {strides = array<i32>} : memref<128x128xf32, #tpu.memory_space<vmem>>, vector<128x128xf32>,
    %c0_i32_8 = arith.constant 0 : i32
    %9 = arith.cmpi eq, %arg2, %c0_i32_8 : i32
    %10 = arith.extui %9 : i1 to i32
    %c0_i32_9 = arith.constant 0 : i32
    %11 = arith.cmpi ne, %10, %c0_i32_9 : i32
    scf.if %11 {
      %c0_10 = arith.constant 0 : index
      %c0_11 = arith.constant 0 : index
      %12 = vector.load %arg8[%c0_10, %c0_11] : memref<128x128xf32, #tpu.memory_space<vmem>>, vector<128x128xf32>
      %c0_12 = arith.constant 0 : index
      %c0_13 = arith.constant 0 : index
      %13 = vector.load %arg5[%c0_12, %c0_13] : memref<1x128xf32, #tpu.memory_space<vmem>>, vector<1x128xf32>
      %14 = vector.broadcast %13 : vector<1x128xf32> to vector<128x128xf32>
      %15 = arith.mulf %12, %14 : vector<128x128xf32>
      %c0_14 = arith.constant 0 : index
      %c0_15 = arith.constant 0 : index
      %16 = vector.load %arg6[%c0_14, %c0_15] : memref<1x128xf32, #tpu.memory_space<vmem>>, vector<1x128xf32>
      %17 = vector.broadcast %16 : vector<1x128xf32> to vector<128x128xf32>
      %18 = arith.addf %15, %17 : vector<128x128xf32>
      %cst_16 = arith.constant 0.000000e+00 : f32
      %19 = vector.broadcast %cst_16 : f32 to vector<128x128xf32>
      %20 = arith.cmpf oge, %18, %19 : vector<128x128xf32>
      %c0_17 = arith.constant 0 : index
      %c0_18 = arith.constant 0 : index
      %21 = vector.load %arg7[%c0_17, %c0_18] : memref<1x128xf32, #tpu.memory_space<vmem>>, vector<1x128xf32>
      %22 = vector.broadcast %21 : vector<1x128xf32> to vector<128x128xf32>
      %23 = arith.mulf %22, %18 : vector<128x128xf32>
      %24 = arith.select %20, %18, %23 : vector<128x128xi1>, vector<128x128xf32>
      %c0_19 = arith.constant 0 : index
      %c0_20 = arith.constant 0 : index
      %25 = vector.load %arg8[%c0_19, %c0_20] : memref<128x128xf32, #tpu.memory_space<vmem>>, vector<128x128xf32>
      tpu.vector_store %arg8[%c0_19, %c0_20], %24 {strides = array<i32>} : memref<128x128xf32, #tpu.memory_space<vmem>>, vector<128x128xf32>,
    } else {
    }
    return
  }
  func.func @transform_0(%arg0: i32, %arg1: i32, %arg2: i32) -> (i32, i32) {
    %c0_i32 = arith.constant 0 : i32
    return %arg0, %arg2 : i32, i32
  }
  func.func @transform_1(%arg0: i32, %arg1: i32, %arg2: i32) -> (i32, i32) {
    %c0_i32 = arith.constant 0 : i32
    return %arg2, %arg1 : i32, i32
  }
  func.func @transform_2(%arg0: i32, %arg1: i32, %arg2: i32) -> (i32, i32) {
    %c0_i32 = arith.constant 0 : i32
    %c0_i32_0 = arith.constant 0 : i32
    return %c0_i32, %arg1 : i32, i32
  }
  func.func @transform_3(%arg0: i32, %arg1: i32, %arg2: i32) -> (i32, i32) {
    %c0_i32 = arith.constant 0 : i32
    %c0_i32_0 = arith.constant 0 : i32
    return %c0_i32, %arg1 : i32, i32
  }
  func.func @transform_4(%arg0: i32, %arg1: i32, %arg2: i32) -> (i32, i32) {
    %c0_i32 = arith.constant 0 : i32
    %c0_i32_0 = arith.constant 0 : i32
    return %c0_i32, %arg1 : i32, i32
  }
  func.func @transform_5(%arg0: i32, %arg1: i32, %arg2: i32) -> (i32, i32) {
    %c0_i32 = arith.constant 0 : i32
    return %arg0, %arg1 : i32, i32
  }
}

</mosaic_0001>

<bundles_post_ra>
// kernel: tpu_custom_call.1
= control target key start
LH: loop header
LB: loop body
LE: loop exit
PB: predicated region body
PF: predicated region fallthrough
CT: control target
= control target key end

     0   :  { %10 = vsyncpa [#allocation3], 0  ;;  %s5016_s0 = inlined_call_operand.hbm [shape: bf16[128,2304], index: 0, kind: input, shape index: {}]   ;;  %s5017_s1 = inlined_call_operand.hbm [shape: bf16[2304,128], index: 1, kind: input, shape index: {}]   ;;  %s5018_s2 = inlined_call_operand.vmem [shape: f32[1,128], index: 2, kind: input, shape index: {}]   ;;  %s5019_s3 = inlined_call_operand.vmem [shape: f32[1,128], index: 3, kind: input, shape index: {}]   ;;  %s5020_s4 = inlined_call_operand.vmem [shape: f32[1,128], index: 4, kind: input, shape index: {}]   ;;  %s5021_s5 = inlined_call_operand.hbm [shape: f32[128,128], index: 5, kind: output, shape index: {}]  }
   0x1   :  { %11 = vsyncpa [#allocation6], 0 }
   0x2   :  { %12 = vsyncpa [#allocation4], 0  ;;  %s17_s20 = sshll.u32 %s5016_s0, 4  ;;  %s4713_s21 = smov [#allocation2]   ;;  %s18_s20 = int_to_ptr.hbm [resolvable:$true] %s17_s20 }
   0x3   :  { %s19_s22 = sshll.u32 %s4713_s21, 4  ;;  %s30_s25 = sshll.u32 %s5017_s1, 4  ;;  %s20_s22 = int_to_ptr.vmem [resolvable:$true] %s19_s22  ;;  %s31_s25 = int_to_ptr.hbm [resolvable:$true] %s30_s25 }
   0x4   :  { %s4714_s26 = smov 1152   ;;  %s4715_s27 = smov 72  }
   0x5   :  { %25 = dma.hbm_to_vmem [thread:$0]  %s18_s20, 18432, %s20_s22, [#allocation3], %s4714_s26, %s4714_s26, %s4715_s27  }
   0x6   :  { %s4716_s28 = smov [#allocation5]   ;;  %s4717_s30 = smov 64  }
   0x7   :  { %s32_s29 = sshll.u32 %s4716_s28, 4  ;;  %s4718_s6 = smov 4   ;;  %s33_s29 = int_to_ptr.vmem [resolvable:$true] %s32_s29 }
   0x8   :  { %38 = dma.hbm_to_vmem [thread:$0]  %s31_s25, 18432, %s33_s29, [#allocation6], %s4717_s30, %s4717_s30, %s4718_s6  }
   0x9   :  { %4707 = dma.done.wait [#allocation3], 18432  }
   0xa   :  { %4708 = vsyncadd [#allocation3], 4294948864 }
   0xb   :  { %4709 = dma.done.wait [#allocation6], 18432  }
   0xc   :  { %4710 = vsyncadd [#allocation6], 4294948864  ;;  %v4469_v0 = vld [vmem:[#allocation5 + $0x38] sm:$0xff]  ;;  %v4468_v2 = vld [vmem:[#allocation5 + $0x30] sm:$0xff]  ;;  %s3152_s12 = sshll.u32 %s5021_s5, 4  ;;  %s4720_s13 = smov 128   ;;  %s3153_s12 = int_to_ptr.hbm [resolvable:$true] %s3152_s12 }
   0xd   :  { %v4477_v1 = vld [vmem:[#allocation5 + $0x78] sm:$0xff]  ;;  %4606 = vmatpush.bf16.msra.mxu2 %v4469_v0  ;;  %v4476_v3 = vld [vmem:[#allocation5 + $0x70] sm:$0xff]  ;;  %2105 = vmatpush.bf16.msra.mxu0 %v4469_v0  ;;  %v4467_v4 = vld [vmem:[#allocation5 + $0x28] sm:$0xff]  ;;  %s4721_s14 = smov 8  }
   0xe   :  { %4614 = vmatpush.bf16.msra.mxu3 %v4477_v1  ;;  %2154 = vmatpush.bf16.msra.mxu1 %v4477_v1  ;;  %v4475_v5 = vld [vmem:[#allocation5 + $0x68] sm:$0xff]  ;;  %v4466_v6 = vld [vmem:[#allocation5 + $0x20] sm:$0xff]  ;;  %v4465_v8 = vld [vmem:[#allocation5 + $0x18] sm:$0xff] }
   0xf   :  { %v4474_v7 = vld [vmem:[#allocation5 + $0x60] sm:$0xff]  ;;  %v4473_v9 = vld [vmem:[#allocation5 + $0x58] sm:$0xff]  ;;  %v4464_v10 = vld [vmem:[#allocation5 + $0x10] sm:$0xff] }
  0x10   :  { %v4472_v11 = vld [vmem:[#allocation5 + $0x50] sm:$0xff]  ;;  %v4463_v12 = vld [vmem:[#allocation5 + $0x8] sm:$0xff]  ;;  %v4462_v14 = vld [vmem:[#allocation5] sm:$0xff] }
  0x11   :  { %4607 = vmatpush.bf16.msra.mxu2 %v4468_v2  ;;  %2106 = vmatpush.bf16.msra.mxu0 %v4468_v2  ;;  %v4471_v13 = vld [vmem:[#allocation5 + $0x48] sm:$0xff]  ;;  %v4470_v15 = vld [vmem:[#allocation5 + $0x40] sm:$0xff]  ;;  %v4485_v24 = vld [vmem:[#allocation5 + $0xb8] sm:$0xff] }
  0x12   :  { %4615 = vmatpush.bf16.msra.mxu3 %v4476_v3  ;;  %2155 = vmatpush.bf16.msra.mxu1 %v4476_v3  ;;  %v3456_v16 = vld [vmem:[#allocation2 + $0x240] sm:$0xf]  ;;  %v4399_v17 = vld [vmem:[#allocation2 + $0x284] sm:$0xf0]  ;;  %v4390_v18 = vld [vmem:[#allocation2 + $0x244] sm:$0xf] }
  0x13   :  { %v3458_v19 = vld [vmem:[#allocation2 + $0x288] sm:$0xf0]  ;;  %v3168_v20 = vld [vmem:[#allocation2] sm:$0xf]  ;;  %v4327_v21 = vld [vmem:[#allocation2 + $0x44] sm:$0xf0]  ;;  %v3457_v26 = vor.u32 %v4399_v17, %v3456_v16 }
  0x14   :  { %v4318_v22 = vld [vmem:[#allocation2 + $0x4] sm:$0xf]  ;;  %v3170_v23 = vld [vmem:[#allocation2 + $0x48] sm:$0xf0]  ;;  %v4493_v25 = vld [vmem:[#allocation5 + $0xf8] sm:$0xff]  ;;  %v3461_v27 = vor.u32 %v4390_v18, %v3458_v19  ;;  %v3169_v28 = vor.u32 %v4327_v21, %v3168_v20 }
  0x15   :  { %4608 = vmatpush.bf16.msra.mxu2 %v4467_v4  ;;  %2107 = vmatpush.bf16.msra.mxu0 %v4467_v4  ;;  %v3173_v29 = vor.u32 %v4318_v22, %v3170_v23  ;;  %v4501_v30 = vld [vmem:[#allocation5 + $0x138] sm:$0xff]  ;;  %v4484_v32 = vld [vmem:[#allocation5 + $0xb0] sm:$0xff]  ;;  %v4483_v36 = vld [vmem:[#allocation5 + $0xa8] sm:$0xff] }
  0x16   :  { %4616 = vmatpush.bf16.msra.mxu3 %v4475_v5  ;;  %2156 = vmatpush.bf16.msra.mxu1 %v4475_v5  ;;  %v4509_v31 = vld [vmem:[#allocation5 + $0x178] sm:$0xff]  ;;  %v4492_v33 = vld [vmem:[#allocation5 + $0xf0] sm:$0xff]  ;;  %v4491_v37 = vld [vmem:[#allocation5 + $0xe8] sm:$0xff] }
  0x17   :  { %v4500_v34 = vld [vmem:[#allocation5 + $0x130] sm:$0xff]  ;;  %v4499_v38 = vld [vmem:[#allocation5 + $0x128] sm:$0xff]  ;;  %v4482_v41 = vld [vmem:[#allocation5 + $0xa0] sm:$0xff] }
  0x18   :  { %v4508_v35 = vld [vmem:[#allocation5 + $0x170] sm:$0xff]  ;;  %v4507_v39 = vld [vmem:[#allocation5 + $0x168] sm:$0xff]  ;;  %v4490_v42 = vld [vmem:[#allocation5 + $0xe0] sm:$0xff] }
  0x19   :  { %4609 = vmatpush.bf16.msra.mxu2 %v4466_v6  ;;  %2108 = vmatpush.bf16.msra.mxu0 %v4466_v6  ;;  %v3528_v40 = vld [vmem:[#allocation2 + $0x2d0] sm:$0xf]  ;;  %v4417_v43 = vld [vmem:[#allocation2 + $0x314] sm:$0xf0]  ;;  %v4408_v44 = vld [vmem:[#allocation2 + $0x2d4] sm:$0xf] }
  0x1a   :  { %4617 = vmatpush.bf16.msra.mxu3 %v4474_v7  ;;  %2157 = vmatpush.bf16.msra.mxu1 %v4474_v7  ;;  %v3530_v45 = vld [vmem:[#allocation2 + $0x318] sm:$0xf0]  ;;  %v3240_v46 = vld [vmem:[#allocation2 + $0x90] sm:$0xf]  ;;  %v4345_v47 = vld [vmem:[#allocation2 + $0xd4] sm:$0xf0]  ;;  %v3529_v54 = vor.u32 %v4417_v43, %v3528_v40 }
  0x1b   :  { %v4336_v48 = vld [vmem:[#allocation2 + $0x94] sm:$0xf]  ;;  %v3242_v49 = vld [vmem:[#allocation2 + $0xd8] sm:$0xf0]  ;;  %v4498_v50 = vld [vmem:[#allocation5 + $0x120] sm:$0xff]  ;;  %v3533_v55 = vor.u32 %v4408_v44, %v3530_v45  ;;  %v3241_v56 = vor.u32 %v4345_v47, %v3240_v46 }
  0x1c   :  { %v4506_v51 = vld [vmem:[#allocation5 + $0x160] sm:$0xff]  ;;  %v4481_v52 = vld [vmem:[#allocation5 + $0x98] sm:$0xff]  ;;  %v3245_v57 = vor.u32 %v4336_v48, %v3242_v49  ;;  %v4480_v60 = vld [vmem:[#allocation5 + $0x90] sm:$0xff] }
  0x1d   :  { %4610 = vmatpush.bf16.msra.mxu2 %v4465_v8  ;;  %2109 = vmatpush.bf16.msra.mxu0 %v4465_v8  ;;  %v4489_v53 = vld [vmem:[#allocation5 + $0xd8] sm:$0xff]  ;;  %v4488_v61 = vld [vmem:[#allocation5 + $0xd0] sm:$0xff]  ;;  %v4479_v0 = vld [vmem:[#allocation5 + $0x88] sm:$0xff] }
  0x1e   :  { %4618 = vmatpush.bf16.msra.mxu3 %v4473_v9  ;;  %2158 = vmatpush.bf16.msra.mxu1 %v4473_v9  ;;  %v4497_v58 = vld [vmem:[#allocation5 + $0x118] sm:$0xff]  ;;  %v4496_v62 = vld [vmem:[#allocation5 + $0x110] sm:$0xff]  ;;  %v4487_v1 = vld [vmem:[#allocation5 + $0xc8] sm:$0xff] }
  0x1f   :  { %v4505_v59 = vld [vmem:[#allocation5 + $0x158] sm:$0xff]  ;;  %v4504_v63 = vld [vmem:[#allocation5 + $0x150] sm:$0xff]  ;;  %v4495_v2 = vld [vmem:[#allocation5 + $0x108] sm:$0xff] }
  0x20   :  { %v4503_v3 = vld [vmem:[#allocation5 + $0x148] sm:$0xff]  ;;  %v4478_v4 = vld [vmem:[#allocation5 + $0x80] sm:$0xff]  ;;  %v4517_v20 = vld [vmem:[#allocation5 + $0x1b8] sm:$0xff] }
  0x21   :  { %4611 = vmatpush.bf16.msra.mxu2 %v4464_v10  ;;  %2110 = vmatpush.bf16.msra.mxu0 %v4464_v10  ;;  %v4486_v5 = vld [vmem:[#allocation5 + $0xc0] sm:$0xff]  ;;  %v4435_v7 = vld [vmem:[#allocation2 + $0x3a4] sm:$0xf0]  ;;  %v3602_v9 = vld [vmem:[#allocation2 + $0x3a8] sm:$0xf0] }
  0x22   :  { %4619 = vmatpush.bf16.msra.mxu3 %v4472_v11  ;;  %2159 = vmatpush.bf16.msra.mxu1 %v4472_v11  ;;  %v3600_v6 = vld [vmem:[#allocation2 + $0x360] sm:$0xf]  ;;  %v4426_v8 = vld [vmem:[#allocation2 + $0x364] sm:$0xf]  ;;  %v4363_v11 = vld [vmem:[#allocation2 + $0x164] sm:$0xf0] }
  0x23   :  { %v3312_v10 = vld [vmem:[#allocation2 + $0x120] sm:$0xf]  ;;  %v3605_v16 = vor.u32 %v4426_v8, %v3602_v9  ;;  %v4525_v21 = vld [vmem:[#allocation5 + $0x1f8] sm:$0xff]  ;;  %v3176_v40 = vld [vmem:[#allocation2 + $0x8] sm:$0xf] }
  0x24   :  { %v3313_v17 = vor.u32 %v4363_v11, %v3312_v10  ;;  %v4502_v19 = vld [vmem:[#allocation5 + $0x140] sm:$0xff]  ;;  %v4533_v22 = vld [vmem:[#allocation5 + $0x238] sm:$0xff]  ;;  %v3178_v43 = vld [vmem:[#allocation2 + $0x50] sm:$0xf0] }
  0x25   :  { %4612 = vmatpush.bf16.msra.mxu2 %v4463_v12  ;;  %2111 = vmatpush.bf16.msra.mxu0 %v4463_v12  ;;  %v4354_v12 = vld [vmem:[#allocation2 + $0x124] sm:$0xf]  ;;  %v4541_v23 = vld [vmem:[#allocation5 + $0x278] sm:$0xff]  ;;  %v3184_v44 = vld [vmem:[#allocation2 + $0x10] sm:$0xf] }
  0x26   :  { %4620 = vmatpush.bf16.msra.mxu3 %v4471_v13  ;;  %2160 = vmatpush.bf16.msra.mxu1 %v4471_v13  ;;  %v3314_v13 = vld [vmem:[#allocation2 + $0x168] sm:$0xf0]  ;;  %v4329_v45 = vld [vmem:[#allocation2 + $0x54] sm:$0xf0]  ;;  %v4320_v46 = vld [vmem:[#allocation2 + $0x14] sm:$0xf] }
  0x27   :  { %v3317_v18 = vor.u32 %v4354_v12, %v3314_v13  ;;  %v3186_v47 = vld [vmem:[#allocation2 + $0x58] sm:$0xf0]  ;;  %v3320_v8 = vld [vmem:[#allocation2 + $0x128] sm:$0xf]  ;;  %v4364_v9 = vld [vmem:[#allocation2 + $0x16c] sm:$0xf0] }
  0x28   :  { %v4355_v10 = vld [vmem:[#allocation2 + $0x12c] sm:$0xf]  ;;  %v3322_v11 = vld [vmem:[#allocation2 + $0x170] sm:$0xf0]  ;;  %v3328_v12 = vld [vmem:[#allocation2 + $0x130] sm:$0xf] }
  0x29   :  { %4613 = vmatpush.bf16.msra.mxu2 %v4462_v14  ;;  %2112 = vmatpush.bf16.msra.mxu0 %v4462_v14  ;;  %v4494_v14 = vld [vmem:[#allocation5 + $0x100] sm:$0xff]  ;;  %v4365_v13 = vld [vmem:[#allocation2 + $0x174] sm:$0xf0] }
  0x2a   :  { %4621 = vmatpush.bf16.msra.mxu3 %v4470_v15  ;;  %2161 = vmatpush.bf16.msra.mxu1 %v4470_v15  ;;  %v3601_v15 = vor.u32 %v4435_v7, %v3600_v6  ;;  %v4530_v6 = vld [vmem:[#allocation5 + $0x220] sm:$0xff] }
  0x2b   :  { %v4538_v7 = vld [vmem:[#allocation5 + $0x260] sm:$0xff] }
  0x2c   :  { %2133 = vmatmul.bf16.vlgmr.msra.gmra.mxu2 %v3457_v26  ;;  %2113 = vmatmul.bf16.vlgmr.msra.gmra.mxu0 %v3169_v28  ;;  %v4444_v26 = vld [vmem:[#allocation2 + $0x3f4] sm:$0xf]  ;;  %v3384_v28 = vld [vmem:[#allocation2 + $0x1b0] sm:$0xf] }
  0x2d   :  { %2203 = vmatpush.bf16.msrb.mxu2 %v4485_v24  ;;  %2182 = vmatmul.bf16.vlgmr.msra.gmra.mxu3 %v3461_v27  ;;  %v3672_v24 = vld [vmem:[#allocation2 + $0x3f0] sm:$0xf]  ;;  %v3674_v27 = vld [vmem:[#allocation2 + $0x438] sm:$0xf0] }
  0x2e   :  { %2252 = vmatpush.bf16.msrb.mxu3 %v4493_v25  ;;  %2162 = vmatmul.bf16.vlgmr.msra.gmra.mxu1 %v3173_v29  ;;  %v4453_v25 = vld [vmem:[#allocation2 + $0x434] sm:$0xf0] }
  0x2f   :  { %2301 = vmatpush.bf16.msrb.mxu0 %v4501_v30  ;;  %2350 = vmatpush.bf16.msrb.mxu1 %v4509_v31  ;;  %v4381_v29 = vld [vmem:[#allocation2 + $0x1f4] sm:$0xf0]  ;;  %v4372_v30 = vld [vmem:[#allocation2 + $0x1b4] sm:$0xf]  ;;  %v3386_v31 = vld [vmem:[#allocation2 + $0x1f8] sm:$0xf0] }
  0x31   :  { %2204 = vmatpush.bf16.msrb.mxu2 %v4484_v32  ;;  %v3673_v32 = vor.u32 %v4453_v25, %v3672_v24  ;;  %v4382_v24 = vld [vmem:[#allocation2 + $0x1fc] sm:$0xf0]  ;;  %v4373_v25 = vld [vmem:[#allocation2 + $0x1bc] sm:$0xf] }
  0x32   :  { %2253 = vmatpush.bf16.msrb.mxu3 %v4492_v33  ;;  %v3677_v33 = vor.u32 %v4444_v26, %v3674_v27  ;;  %v3394_v26 = vld [vmem:[#allocation2 + $0x200] sm:$0xf0]  ;;  %v3400_v27 = vld [vmem:[#allocation2 + $0x1c0] sm:$0xf] }
  0x33   :  { %2302 = vmatpush.bf16.msrb.mxu0 %v4500_v34  ;;  %2351 = vmatpush.bf16.msrb.mxu1 %v4508_v35  ;;  %v3385_v34 = vor.u32 %v4381_v29, %v3384_v28  ;;  %v3389_v35 = vor.u32 %v4372_v30, %v3386_v31  ;;  %v4383_v28 = vld [vmem:[#allocation2 + $0x204] sm:$0xf0]  ;;  %v4374_v29 = vld [vmem:[#allocation2 + $0x1c4] sm:$0xf]  ;;  %v3402_v30 = vld [vmem:[#allocation2 + $0x208] sm:$0xf0] }
  0x35   :  { %2205 = vmatpush.bf16.msrb.mxu2 %v4483_v36  ;;  %v4516_v36 = vld [vmem:[#allocation5 + $0x1b0] sm:$0xff] }
  0x36   :  { %2254 = vmatpush.bf16.msrb.mxu3 %v4491_v37  ;;  %v4524_v37 = vld [vmem:[#allocation5 + $0x1f0] sm:$0xff] }
  0x37   :  { %2303 = vmatpush.bf16.msrb.mxu0 %v4499_v38  ;;  %2352 = vmatpush.bf16.msrb.mxu1 %v4507_v39  ;;  %v4532_v38 = vld [vmem:[#allocation5 + $0x230] sm:$0xff] }
  0x38   :  { %v4540_v39 = vld [vmem:[#allocation5 + $0x270] sm:$0xff] }
  0x39   :  { %2206 = vmatpush.bf16.msrb.mxu2 %v4482_v41  ;;  %v4328_v41 = vld [vmem:[#allocation2 + $0x4c] sm:$0xf0] }
  0x3a   :  { %2255 = vmatpush.bf16.msrb.mxu3 %v4490_v42  ;;  %v4319_v42 = vld [vmem:[#allocation2 + $0xc] sm:$0xf]  ;;  %v3177_v48 = vor.u32 %v4328_v41, %v3176_v40  ;;  %v4400_v40 = vld [vmem:[#allocation2 + $0x28c] sm:$0xf0] }
  0x3b   :  { %2304 = vmatpush.bf16.msrb.mxu0 %v4498_v50  ;;  %2353 = vmatpush.bf16.msrb.mxu1 %v4506_v51  ;;  %v3181_v49 = vor.u32 %v4319_v42, %v3178_v43  ;;  %v3185_v50 = vor.u32 %v4329_v45, %v3184_v44  ;;  %v3189_v51 = vor.u32 %v4320_v46, %v3186_v47  ;;  %v4391_v41 = vld [vmem:[#allocation2 + $0x24c] sm:$0xf]  ;;  %v3466_v42 = vld [vmem:[#allocation2 + $0x290] sm:$0xf0]  ;;  %v3472_v43 = vld [vmem:[#allocation2 + $0x250] sm:$0xf] }
  0x3c   :  { %2138 = vmatmul.bf16.gmra.mxu2 %v3529_v54  ;;  %2118 = vmatmul.bf16.gmra.mxu0 %v3241_v56  ;;  %v4531_v54 = vld [vmem:[#allocation5 + $0x228] sm:$0xff]  ;;  %v3248_v56 = vld [vmem:[#allocation2 + $0x98] sm:$0xf]  ;;  %v4392_v45 = vld [vmem:[#allocation2 + $0x254] sm:$0xf] }
  0x3d   :  { %2207 = vmatpush.bf16.msrb.mxu2 %v4481_v52  ;;  %2187 = vmatmul.bf16.gmra.mxu3 %v3533_v55  ;;  %v4515_v52 = vld [vmem:[#allocation5 + $0x1a8] sm:$0xff]  ;;  %v4401_v44 = vld [vmem:[#allocation2 + $0x294] sm:$0xf0]  ;;  %v3474_v46 = vld [vmem:[#allocation2 + $0x298] sm:$0xf0] }
  0x3e   :  { %2256 = vmatpush.bf16.msrb.mxu3 %v4489_v53  ;;  %2167 = vmatmul.bf16.gmra.mxu1 %v3245_v57  ;;  %v4523_v53 = vld [vmem:[#allocation5 + $0x1e8] sm:$0xff]  ;;  %v4346_v57 = vld [vmem:[#allocation2 + $0xdc] sm:$0xf0] }
  0x3f   :  { %2305 = vmatpush.bf16.msrb.mxu0 %v4497_v58  ;;  %2354 = vmatpush.bf16.msrb.mxu1 %v4505_v59  ;;  %v4539_v55 = vld [vmem:[#allocation5 + $0x268] sm:$0xff]  ;;  %v4337_v58 = vld [vmem:[#allocation2 + $0x9c] sm:$0xf]  ;;  %v3250_v59 = vld [vmem:[#allocation2 + $0xe0] sm:$0xf0] }
  0x41   :  { %2208 = vmatpush.bf16.msrb.mxu2 %v4480_v60  ;;  %v3256_v60 = vld [vmem:[#allocation2 + $0xa0] sm:$0xf] }
  0x42   :  { %2257 = vmatpush.bf16.msrb.mxu3 %v4488_v61  ;;  %v4347_v61 = vld [vmem:[#allocation2 + $0xe4] sm:$0xf0] }
  0x43   :  { %2306 = vmatpush.bf16.msrb.mxu0 %v4496_v62  ;;  %2355 = vmatpush.bf16.msrb.mxu1 %v4504_v63  ;;  %v4338_v62 = vld [vmem:[#allocation2 + $0xa4] sm:$0xf]  ;;  %v3258_v63 = vld [vmem:[#allocation2 + $0xe8] sm:$0xf0] }
  0x45   :  { %2209 = vmatpush.bf16.msrb.mxu2 %v4479_v0  ;;  %v3249_v0 = vor.u32 %v4346_v57, %v3248_v56  ;;  %v4519_v56 = vld [vmem:[#allocation5 + $0x1c8] sm:$0xff] }
  0x46   :  { %2258 = vmatpush.bf16.msrb.mxu3 %v4487_v1  ;;  %v3253_v1 = vor.u32 %v4337_v58, %v3250_v59 }
  0x47   :  { %2307 = vmatpush.bf16.msrb.mxu0 %v4495_v2  ;;  %2356 = vmatpush.bf16.msrb.mxu1 %v4503_v3  ;;  %v3257_v2 = vor.u32 %v4347_v61, %v3256_v60  ;;  %v3261_v3 = vor.u32 %v4338_v62, %v3258_v63  ;;  %v4527_v63 = vld [vmem:[#allocation5 + $0x208] sm:$0xff] }
  0x49   :  { %2210 = vmatpush.bf16.msrb.mxu2 %v4478_v4  ;;  %v4514_v4 = vld [vmem:[#allocation5 + $0x1a0] sm:$0xff] }
  0x4a   :  { %2259 = vmatpush.bf16.msrb.mxu3 %v4486_v5  ;;  %v4522_v5 = vld [vmem:[#allocation5 + $0x1e0] sm:$0xff] }
  0x4b   :  { %2308 = vmatpush.bf16.msrb.mxu0 %v4494_v14  ;;  %2357 = vmatpush.bf16.msrb.mxu1 %v4502_v19  ;;  %v4356_v14 = vld [vmem:[#allocation2 + $0x134] sm:$0xf] }
  0x4c   :  { %2143 = vmatmul.bf16.gmra.mxu2 %v3601_v15  ;;  %2123 = vmatmul.bf16.gmra.mxu0 %v3313_v17  ;;  %v3330_v15 = vld [vmem:[#allocation2 + $0x178] sm:$0xf0]  ;;  %v3325_v17 = vor.u32 %v4355_v10, %v3322_v11 }
  0x4d   :  { %2192 = vmatmul.bf16.gmra.mxu3 %v3605_v16  ;;  %2399 = vmatpush.bf16.msra.mxu2 %v4517_v20  ;;  %v3321_v16 = vor.u32 %v4364_v9, %v3320_v8  ;;  %v3333_v19 = vor.u32 %v4356_v14, %v3330_v15  ;;  %v4513_v20 = vld [vmem:[#allocation5 + $0x198] sm:$0xff] }
  0x4e   :  { %2172 = vmatmul.bf16.gmra.mxu1 %v3317_v18  ;;  %2448 = vmatpush.bf16.msra.mxu3 %v4525_v21  ;;  %v3329_v18 = vor.u32 %v4365_v13, %v3328_v12  ;;  %v4521_v21 = vld [vmem:[#allocation5 + $0x1d8] sm:$0xff]  ;;  %v4535_v13 = vld [vmem:[#allocation5 + $0x248] sm:$0xff] }
  0x4f   :  { %2497 = vmatpush.bf16.msra.mxu0 %v4533_v22  ;;  %2546 = vmatpush.bf16.msra.mxu1 %v4541_v23  ;;  %v4529_v22 = vld [vmem:[#allocation5 + $0x218] sm:$0xff] }
  0x50   :  { %v3392_v23 = vld [vmem:[#allocation2 + $0x1b8] sm:$0xf] }
  0x51   :  { %2400 = vmatpush.bf16.msra.mxu2 %v4516_v36  ;;  %v3393_v31 = vor.u32 %v4382_v24, %v3392_v23  ;;  %v4512_v36 = vld [vmem:[#allocation5 + $0x190] sm:$0xff] }
  0x52   :  { %2449 = vmatpush.bf16.msra.mxu3 %v4524_v37  ;;  %v4520_v37 = vld [vmem:[#allocation5 + $0x1d0] sm:$0xff] }
  0x53   :  { %2498 = vmatpush.bf16.msra.mxu0 %v4532_v38  ;;  %2547 = vmatpush.bf16.msra.mxu1 %v4540_v39  ;;  %v4528_v38 = vld [vmem:[#allocation5 + $0x210] sm:$0xff]  ;;  %v3464_v39 = vld [vmem:[#allocation2 + $0x248] sm:$0xf] }
  0x54   :  { %v3465_v47 = vor.u32 %v4400_v40, %v3464_v39 }
  0x55   :  { %2401 = vmatpush.bf16.msra.mxu2 %v4515_v52 }
  0x56   :  { %2450 = vmatpush.bf16.msra.mxu3 %v4523_v53 }
  0x57   :  { %2499 = vmatpush.bf16.msra.mxu0 %v4531_v54  ;;  %2548 = vmatpush.bf16.msra.mxu1 %v4539_v55  ;;  %v4511_v55 = vld [vmem:[#allocation5 + $0x188] sm:$0xff] }
  0x59   :  { %2402 = vmatpush.bf16.msra.mxu2 %v4514_v4  ;;  %v3544_v4 = vld [vmem:[#allocation2 + $0x2e0] sm:$0xf] }
  0x5a   :  { %2451 = vmatpush.bf16.msra.mxu3 %v4522_v5  ;;  %v4419_v5 = vld [vmem:[#allocation2 + $0x324] sm:$0xf0] }
  0x5b   :  { %2500 = vmatpush.bf16.msra.mxu0 %v4530_v6  ;;  %2549 = vmatpush.bf16.msra.mxu1 %v4538_v7  ;;  %v4410_v6 = vld [vmem:[#allocation2 + $0x2e4] sm:$0xf]  ;;  %v3546_v7 = vld [vmem:[#allocation2 + $0x328] sm:$0xf0]  ;;  %v3545_v14 = vor.u32 %v4419_v5, %v3544_v4 }
  0x5c   :  { %2148 = vmatmul.bf16.gmra.mxu2 %v3673_v32  ;;  %2128 = vmatmul.bf16.gmra.mxu0 %v3385_v34  ;;  %v3397_v32 = vor.u32 %v4373_v25, %v3394_v26  ;;  %v3401_v34 = vor.u32 %v4383_v28, %v3400_v27  ;;  %v3549_v15 = vor.u32 %v4410_v6, %v3546_v7  ;;  %v4526_v27 = vld [vmem:[#allocation5 + $0x200] sm:$0xff]  ;;  %v3608_v28 = vld [vmem:[#allocation2 + $0x368] sm:$0xf] }
  0x5d   :  { %2197 = vmatmul.bf16.gmra.mxu3 %v3677_v33  ;;  %2403 = vmatpush.bf16.msra.mxu2 %v4513_v20  ;;  %v4537_v33 = vld [vmem:[#allocation5 + $0x258] sm:$0xff]  ;;  %v4518_v20 = vld [vmem:[#allocation5 + $0x1c0] sm:$0xff] }
  0x5e   :  { %2177 = vmatmul.bf16.gmra.mxu1 %v3389_v35  ;;  %2452 = vmatpush.bf16.msra.mxu3 %v4521_v21  ;;  %v3405_v35 = vor.u32 %v4374_v29, %v3402_v30  ;;  %v4436_v29 = vld [vmem:[#allocation2 + $0x3ac] sm:$0xf0]  ;;  %v4427_v30 = vld [vmem:[#allocation2 + $0x36c] sm:$0xf] }
  0x5f   :  { %2501 = vmatpush.bf16.msra.mxu0 %v4529_v22  ;;  %2550 = vmatpush.bf16.msra.mxu1 %v4537_v33  ;;  %v4437_v33 = vld [vmem:[#allocation2 + $0x3b4] sm:$0xf0]  ;;  %v3609_v39 = vor.u32 %v4436_v29, %v3608_v28  ;;  %v4564_v28 = vld [vmem:[#allocation5 + $0x330] sm:$0xff]  ;;  %v4321_v29 = vld [vmem:[#allocation2 + $0x1c] sm:$0xf] }
  0x61   :  { %2404 = vmatpush.bf16.msra.mxu2 %v4512_v36 }
  0x62   :  { %2453 = vmatpush.bf16.msra.mxu3 %v4520_v37 }
  0x63   :  { %2502 = vmatpush.bf16.msra.mxu0 %v4528_v38 }
  0x65   :  { %2405 = vmatpush.bf16.msra.mxu2 %v4511_v55 }
  0x66   :  { %2454 = vmatpush.bf16.msra.mxu3 %v4519_v56  ;;  %v3680_v56 = vld [vmem:[#allocation2 + $0x3f8] sm:$0xf] }
  0x67   :  { %2503 = vmatpush.bf16.msra.mxu0 %v4527_v63  ;;  %v3688_v63 = vld [vmem:[#allocation2 + $0x400] sm:$0xf] }
  0x6a   :  { %2455 = vmatpush.bf16.msra.mxu3 %v4518_v20 }
  0x6b   :  { %2504 = vmatpush.bf16.msra.mxu0 %v4526_v27  ;;  %v4330_v27 = vld [vmem:[#allocation2 + $0x5c] sm:$0xf0] }
  0x6c   :  { %2211 = vmatmul.bf16.vlgmr.msrb.gmra.mxu2 %v3177_v48  ;;  %2309 = vmatmul.bf16.vlgmr.msrb.gmra.mxu0 %v3185_v50  ;;  %v3469_v48 = vor.u32 %v4391_v41, %v3466_v42  ;;  %v3473_v50 = vor.u32 %v4401_v44, %v3472_v43  ;;  %v4534_v41 = vld [vmem:[#allocation5 + $0x240] sm:$0xff] }
  0x6d   :  { %2260 = vmatmul.bf16.vlgmr.msrb.gmra.mxu3 %v3181_v49  ;;  %v4536_v49 = vld [vmem:[#allocation5 + $0x250] sm:$0xff] }
  0x6e   :  { %2358 = vmatmul.bf16.vlgmr.msrb.gmra.mxu1 %v3189_v51  ;;  %v3477_v51 = vor.u32 %v4392_v45, %v3474_v46 }
  0x6f   :  { %2551 = vmatpush.bf16.msra.mxu1 %v4536_v49 }
  0x73   :  { %2552 = vmatpush.bf16.msra.mxu1 %v4535_v13 }
  0x77   :  { %2553 = vmatpush.bf16.msra.mxu1 %v4534_v41 }
  0x7c   :  { %2216 = vmatmul.bf16.gmra.mxu2 %v3249_v0  ;;  %2314 = vmatmul.bf16.gmra.mxu0 %v3257_v2  ;;  %v3536_v0 = vld [vmem:[#allocation2 + $0x2d8] sm:$0xf]  ;;  %v4409_v2 = vld [vmem:[#allocation2 + $0x2dc] sm:$0xf] }
  0x7d   :  { %2265 = vmatmul.bf16.gmra.mxu3 %v3253_v1  ;;  %v4418_v1 = vld [vmem:[#allocation2 + $0x31c] sm:$0xf0] }
  0x7e   :  { %2363 = vmatmul.bf16.gmra.mxu1 %v3261_v3  ;;  %v3538_v3 = vld [vmem:[#allocation2 + $0x320] sm:$0xf0]  ;;  %v3537_v11 = vor.u32 %v4418_v1, %v3536_v0  ;;  %v4455_v0 = vld [vmem:[#allocation2 + $0x444] sm:$0xf0] }
  0x7f   :  { %v3541_v12 = vor.u32 %v4409_v2, %v3538_v3  ;;  %v4446_v1 = vld [vmem:[#allocation2 + $0x404] sm:$0xf]  ;;  %v3690_v2 = vld [vmem:[#allocation2 + $0x448] sm:$0xf0] }
  0x8c   :  { %2221 = vmatmul.bf16.gmra.mxu2 %v3321_v16  ;;  %2319 = vmatmul.bf16.gmra.mxu0 %v3329_v18 }
  0x8d   :  { %2270 = vmatmul.bf16.gmra.mxu3 %v3325_v17 }
  0x8e   :  { %2368 = vmatmul.bf16.gmra.mxu1 %v3333_v19  ;;  %v4510_v19 = vld [vmem:[#allocation5 + $0x180] sm:$0xff] }
  0x8f   :  { %2406 = vmatpush.bf16.msra.mxu2 %v4510_v19 }
  0x9c   :  { %2226 = vmatmul.bf16.gmra.mxu2 %v3393_v31  ;;  %2324 = vmatmul.bf16.gmra.mxu0 %v3401_v34  ;;  %v3610_v31 = vld [vmem:[#allocation2 + $0x3b0] sm:$0xf0] }
  0x9d   :  { %2275 = vmatmul.bf16.gmra.mxu3 %v3397_v32  ;;  %v3616_v32 = vld [vmem:[#allocation2 + $0x370] sm:$0xf]  ;;  %v4428_v34 = vld [vmem:[#allocation2 + $0x374] sm:$0xf]  ;;  %v3613_v40 = vor.u32 %v4427_v30, %v3610_v31  ;;  %v3194_v30 = vld [vmem:[#allocation2 + $0x60] sm:$0xf0] }
  0x9e   :  { %2373 = vmatmul.bf16.gmra.mxu1 %v3405_v35  ;;  %v3618_v35 = vld [vmem:[#allocation2 + $0x3b8] sm:$0xf0]  ;;  %v3617_v42 = vor.u32 %v4437_v33, %v3616_v32  ;;  %v3200_v31 = vld [vmem:[#allocation2 + $0x20] sm:$0xf]  ;;  %v4331_v32 = vld [vmem:[#allocation2 + $0x64] sm:$0xf0] }
  0x9f   :  { %v3621_v43 = vor.u32 %v4428_v34, %v3618_v35  ;;  %v4322_v33 = vld [vmem:[#allocation2 + $0x24] sm:$0xf]  ;;  %v3202_v34 = vld [vmem:[#allocation2 + $0x68] sm:$0xf0]  ;;  %v3201_v41 = vor.u32 %v4331_v32, %v3200_v31 }
  0xa9   :  { %v2114_v52 = vpop.f32.mrf.mxu0 }
  0xab   :  { %v2163_v53 = vpop.f32.mrf.mxu1 }
  0xac   :  { %v4758_v54 = vadd.f32 %v2163_v53, %v2114_v52  ;;  %2231 = vmatmul.bf16.gmra.mxu2 %v3465_v47  ;;  %2329 = vmatmul.bf16.gmra.mxu0 %v3473_v50  ;;  %v4549_v47 = vld [vmem:[#allocation5 + $0x2b8] sm:$0xff] }
  0xad   :  { %2280 = vmatmul.bf16.gmra.mxu3 %v3469_v48  ;;  %v4557_v48 = vld [vmem:[#allocation5 + $0x2f8] sm:$0xff]  ;;  %2595 = vmatpush.bf16.msrb.mxu2 %v4549_v47  ;;  %v4547_v47 = vld [vmem:[#allocation5 + $0x2a8] sm:$0xff] }
  0xae   :  { %2378 = vmatmul.bf16.gmra.mxu1 %v3477_v51  ;;  %2644 = vmatpush.bf16.msrb.mxu3 %v4557_v48  ;;  %v4555_v48 = vld [vmem:[#allocation5 + $0x2e8] sm:$0xff] }
  0xaf   :  { %v2134_v57 = vpop.f32.mrf.mxu2 }
  0xb0   :  { %v2183_v58 = vpop.f32.mrf.mxu3 }
  0xb1   :  { %v4760_v59 = vadd.f32 %v2183_v58, %v2134_v57  ;;  %v2116_v60 = vpop.f32.mrf.mxu0  ;;  %v4454_v57 = vld [vmem:[#allocation2 + $0x43c] sm:$0xf0]  ;;  %v4565_v58 = vld [vmem:[#allocation5 + $0x338] sm:$0xff] }
  0xb2   :  { %2693 = vmatpush.bf16.msrb.mxu0 %v4565_v58  ;;  %v3681_v6 = vor.u32 %v4454_v57, %v3680_v56 }
  0xb3   :  { %v2165_v61 = vpop.f32.mrf.mxu1 }
  0xb4   :  { %v4762_v62 = vadd.f32 %v2165_v61, %v2116_v60  ;;  %v4445_v60 = vld [vmem:[#allocation2 + $0x3fc] sm:$0xf]  ;;  %v3682_v61 = vld [vmem:[#allocation2 + $0x440] sm:$0xf0] }
  0xb5   :  { %v3685_v7 = vor.u32 %v4445_v60, %v3682_v61  ;;  %v3264_v60 = vld [vmem:[#allocation2 + $0xa8] sm:$0xf]  ;;  %v4348_v61 = vld [vmem:[#allocation2 + $0xec] sm:$0xf0] }
  0xb6   :  { %2694 = vmatpush.bf16.msrb.mxu0 %v4564_v28 }
  0xb7   :  { %v2136_v8 = vpop.f32.mrf.mxu2 }
  0xb8   :  { %v2185_v9 = vpop.f32.mrf.mxu3 }
  0xb9   :  { %v4764_v10 = vadd.f32 %v2185_v9, %v2136_v8  ;;  %v2119_v16 = vpop.f32.mrf.mxu0  ;;  %v3689_v8 = vor.u32 %v4455_v0, %v3688_v63  ;;  %v3693_v9 = vor.u32 %v4446_v1, %v3690_v2  ;;  %v4563_v63 = vld [vmem:[#allocation5 + $0x328] sm:$0xff]  ;;  %v3266_v1 = vld [vmem:[#allocation2 + $0xf0] sm:$0xf0]  ;;  %v3272_v2 = vld [vmem:[#allocation2 + $0xb0] sm:$0xf] }
  0xba   :  { %v4339_v0 = vld [vmem:[#allocation2 + $0xac] sm:$0xf]  ;;  %2695 = vmatpush.bf16.msrb.mxu0 %v4563_v63  ;;  %v4570_v63 = vld [vmem:[#allocation5 + $0x360] sm:$0xff] }
  0xbb   :  { %v2168_v17 = vpop.f32.mrf.mxu1 }
  0xbc   :  { %v4766_v18 = vadd.f32 %v2168_v17, %v2119_v16  ;;  %2236 = vmatmul.bf16.gmra.mxu2 %v3537_v11  ;;  %2334 = vmatmul.bf16.gmra.mxu0 %v3545_v14  ;;  %v4573_v14 = vld [vmem:[#allocation5 + $0x378] sm:$0xff]  ;;  %v4556_v16 = vld [vmem:[#allocation5 + $0x2f0] sm:$0xff] }
  0xbd   :  { %2285 = vmatmul.bf16.gmra.mxu3 %v3541_v12  ;;  %2742 = vmatpush.bf16.msrb.mxu1 %v4573_v14 }
  0xbe   :  { %2383 = vmatmul.bf16.gmra.mxu1 %v3549_v15  ;;  %v4548_v15 = vld [vmem:[#allocation5 + $0x2b0] sm:$0xff]  ;;  %2645 = vmatpush.bf16.msrb.mxu3 %v4556_v16 }
  0xbf   :  { %v2139_v21 = vpop.f32.mrf.mxu2  ;;  %2596 = vmatpush.bf16.msrb.mxu2 %v4548_v15 }
  0xc0   :  { %v2188_v22 = vpop.f32.mrf.mxu3 }
  0xc1   :  { %v4768_v23 = vadd.f32 %v2188_v22, %v2139_v21  ;;  %v2121_v24 = vpop.f32.mrf.mxu0 }
  0xc2   :  { %2646 = vmatpush.bf16.msrb.mxu3 %v4555_v48 }
  0xc3   :  { %v2170_v25 = vpop.f32.mrf.mxu1  ;;  %2597 = vmatpush.bf16.msrb.mxu2 %v4547_v47 }
  0xc4   :  { %v4770_v26 = vadd.f32 %v2170_v25, %v2121_v24  ;;  %v3192_v25 = vld [vmem:[#allocation2 + $0x18] sm:$0xf] }
  0xc7   :  { %v2141_v36 = vpop.f32.mrf.mxu2 }
  0xc8   :  { %v2190_v37 = vpop.f32.mrf.mxu3 }
  0xc9   :  { %v4772_v38 = vadd.f32 %v2190_v37, %v2141_v36  ;;  %v2124_v44 = vpop.f32.mrf.mxu0 }
  0xcb   :  { %v2173_v45 = vpop.f32.mrf.mxu1 }
  0xcc   :  { %v4774_v46 = vadd.f32 %v2173_v45, %v2124_v44  ;;  %2241 = vmatmul.bf16.gmra.mxu2 %v3609_v39  ;;  %2339 = vmatmul.bf16.gmra.mxu0 %v3617_v42  ;;  %v3193_v39 = vor.u32 %v4330_v27, %v3192_v25  ;;  %v3205_v42 = vor.u32 %v4322_v33, %v3202_v34  ;;  %v4572_v45 = vld [vmem:[#allocation5 + $0x370] sm:$0xff]  ;;  %v4546_v25 = vld [vmem:[#allocation5 + $0x2a0] sm:$0xff] }
  0xcd   :  { %2290 = vmatmul.bf16.gmra.mxu3 %v3613_v40  ;;  %v3197_v40 = vor.u32 %v4321_v29, %v3194_v30  ;;  %2743 = vmatpush.bf16.msrb.mxu1 %v4572_v45  ;;  %v4554_v27 = vld [vmem:[#allocation5 + $0x2e0] sm:$0xff]  ;;  %v3346_v45 = vld [vmem:[#allocation2 + $0x188] sm:$0xf0] }
  0xce   :  { %2388 = vmatmul.bf16.gmra.mxu1 %v3621_v43  ;;  %2598 = vmatpush.bf16.msrb.mxu2 %v4546_v25 }
  0xcf   :  { %v2144_v49 = vpop.f32.mrf.mxu2  ;;  %2647 = vmatpush.bf16.msrb.mxu3 %v4554_v27 }
  0xd0   :  { %v2193_v50 = vpop.f32.mrf.mxu3 }
  0xd1   :  { %v4776_v51 = vadd.f32 %v2193_v50, %v2144_v49  ;;  %v2126_v52 = vpop.f32.mrf.mxu0 }
  0xd3   :  { %v2175_v53 = vpop.f32.mrf.mxu1 }
  0xd4   :  { %v4778_v55 = vadd.f32 %v2175_v53, %v2126_v52 }
  0xd7   :  { %v2146_v3 = vpop.f32.mrf.mxu2 }
  0xd8   :  { %v2195_v4 = vpop.f32.mrf.mxu3 }
  0xd9   :  { %v4780_v5 = vadd.f32 %v2195_v4, %v2146_v3  ;;  %v2129_v11 = vpop.f32.mrf.mxu0  ;;  %v4349_v3 = vld [vmem:[#allocation2 + $0xf4] sm:$0xf0]  ;;  %v4340_v4 = vld [vmem:[#allocation2 + $0xb4] sm:$0xf] }
  0xda   :  { %v3273_v14 = vor.u32 %v4349_v3, %v3272_v2 }
  0xdb   :  { %v2178_v12 = vpop.f32.mrf.mxu1 }
  0xdc   :  { %v4782_v13 = vadd.f32 %v2178_v12, %v2129_v11  ;;  %2246 = vmatmul.bf16.gmra.mxu2 %v3681_v6  ;;  %2344 = vmatmul.bf16.gmra.mxu0 %v3689_v8  ;;  %v3274_v6 = vld [vmem:[#allocation2 + $0xf8] sm:$0xf0]  ;;  %v3265_v11 = vor.u32 %v4348_v61, %v3264_v60  ;;  %v3269_v12 = vor.u32 %v4339_v0, %v3266_v1 }
  0xdd   :  { %2295 = vmatmul.bf16.gmra.mxu3 %v3685_v7  ;;  %v3277_v15 = vor.u32 %v4340_v4, %v3274_v6  ;;  %v4545_v0 = vld [vmem:[#allocation5 + $0x298] sm:$0xff] }
  0xde   :  { %2393 = vmatmul.bf16.gmra.mxu1 %v3693_v9  ;;  %v4553_v1 = vld [vmem:[#allocation5 + $0x2d8] sm:$0xff]  ;;  %2599 = vmatpush.bf16.msrb.mxu2 %v4545_v0 }
  0xdf   :  { %v2149_v17 = vpop.f32.mrf.mxu2  ;;  %2648 = vmatpush.bf16.msrb.mxu3 %v4553_v1 }
  0xe0   :  { %v2198_v19 = vpop.f32.mrf.mxu3 }
  0xe1   :  { %v4784_v20 = vadd.f32 %v2198_v19, %v2149_v17  ;;  %v2131_v21 = vpop.f32.mrf.mxu0 }
  0xe3   :  { %v2180_v22 = vpop.f32.mrf.mxu1 }
  0xe4   :  { %v4786_v24 = vadd.f32 %v2180_v22, %v2131_v21  ;;  %v4571_v22 = vld [vmem:[#allocation5 + $0x368] sm:$0xff] }
  0xe5   :  { %2744 = vmatpush.bf16.msrb.mxu1 %v4571_v22  ;;  %v3418_v22 = vld [vmem:[#allocation2 + $0x218] sm:$0xf0] }
  0xe7   :  { %v2151_v35 = vpop.f32.mrf.mxu2 }
  0xe8   :  { %v2200_v36 = vpop.f32.mrf.mxu3 }
  0xe9   :  { %v4788_v37 = vadd.f32 %v2200_v36, %v2151_v35  ;;  %v2310_v43 = vpop.f32.mrf.mxu0  ;;  %v3336_v35 = vld [vmem:[#allocation2 + $0x138] sm:$0xf]  ;;  %v4366_v36 = vld [vmem:[#allocation2 + $0x17c] sm:$0xf0]  ;;  %2745 = vmatpush.bf16.msrb.mxu1 %v4570_v63  ;;  %v3490_v63 = vld [vmem:[#allocation2 + $0x2a8] sm:$0xf0] }
  0xeb   :  { %v2359_v44 = vpop.f32.mrf.mxu1 }
  0xec   :  { %2407 = vmatmul.bf16.vlgmr.msra.gmra.mxu2 %v3193_v39  ;;  %2505 = vmatmul.bf16.vlgmr.msra.gmra.mxu0 %v3201_v41  ;;  %v4562_v39 = vld [vmem:[#allocation5 + $0x320] sm:$0xff] }
  0xed   :  { %2456 = vmatmul.bf16.vlgmr.msra.gmra.mxu3 %v3197_v40  ;;  %v4357_v40 = vld [vmem:[#allocation2 + $0x13c] sm:$0xf]  ;;  %v3338_v41 = vld [vmem:[#allocation2 + $0x180] sm:$0xf0]  ;;  %2696 = vmatpush.bf16.msrb.mxu0 %v4562_v39 }
  0xee   :  { %2554 = vmatmul.bf16.vlgmr.msra.gmra.mxu1 %v3205_v42  ;;  %v3344_v42 = vld [vmem:[#allocation2 + $0x140] sm:$0xf]  ;;  %v4569_v39 = vld [vmem:[#allocation5 + $0x358] sm:$0xff] }
  0xef   :  { %v2212_v49 = vpop.f32.mrf.mxu2  ;;  %2746 = vmatpush.bf16.msrb.mxu1 %v4569_v39  ;;  %v3562_v39 = vld [vmem:[#allocation2 + $0x338] sm:$0xf0] }
  0xf0   :  { %v2261_v50 = vpop.f32.mrf.mxu3  ;;  %v2213_v52 = vadd.f32 %v2212_v49, %v4758_v54 }
  0xf1   :  { %v2312_v56 = vpop.f32.mrf.mxu0 }
  0xf2   :  { %v2262_v53 = vadd.f32 %v2261_v50, %v2213_v52  ;;  %v3337_v50 = vor.u32 %v4366_v36, %v3336_v35  ;;  %v3341_v52 = vor.u32 %v4357_v40, %v3338_v41  ;;  %v4544_v40 = vld [vmem:[#allocation5 + $0x290] sm:$0xff] }
  0xf3   :  { %v2361_v57 = vpop.f32.mrf.mxu1  ;;  %v4552_v41 = vld [vmem:[#allocation5 + $0x2d0] sm:$0xff]  ;;  %2600 = vmatpush.bf16.msrb.mxu2 %v4544_v40 }
  0xf4   :  { %v2311_v58 = vadd.f32 %v2310_v43, %v2262_v53  ;;  %v4367_v43 = vld [vmem:[#allocation2 + $0x184] sm:$0xf0]  ;;  %2649 = vmatpush.bf16.msrb.mxu3 %v4552_v41 }
  0xf5   :  { %v3345_v53 = vor.u32 %v4367_v43, %v3344_v42 }
  0xf6   :  { %v4791_v7 = vadd.f32 %v2359_v44, %v2311_v58  ;;  %v4358_v44 = vld [vmem:[#allocation2 + $0x144] sm:$0xf] }
  0xf7   :  { %v2214_v8 = vpop.f32.mrf.mxu2 }
  0xf8   :  { %v2263_v9 = vpop.f32.mrf.mxu3  ;;  %v2215_v54 = vadd.f32 %v2214_v8, %v4762_v62 }
  0xf9   :  { %v2315_v17 = vpop.f32.mrf.mxu0 }
  0xfa   :  { %v2264_v16 = vadd.f32 %v2263_v9, %v2215_v54 }
  0xfb   :  { %v2364_v19 = vpop.f32.mrf.mxu1 }
  0xfc   :  { %v2313_v21 = vadd.f32 %v2312_v56, %v2264_v16  ;;  %2412 = vmatmul.bf16.gmra.mxu2 %v3265_v11  ;;  %2510 = vmatmul.bf16.gmra.mxu0 %v3273_v14  ;;  %v3349_v56 = vor.u32 %v4358_v44, %v3346_v45  ;;  %v3408_v11 = vld [vmem:[#allocation2 + $0x1c8] sm:$0xf]  ;;  %v4561_v14 = vld [vmem:[#allocation5 + $0x318] sm:$0xff]  ;;  %v3410_v16 = vld [vmem:[#allocation2 + $0x210] sm:$0xf0] }
  0xfd   :  { %2461 = vmatmul.bf16.gmra.mxu3 %v3269_v12  ;;  %v4384_v12 = vld [vmem:[#allocation2 + $0x20c] sm:$0xf0]  ;;  %2697 = vmatpush.bf16.msrb.mxu0 %v4561_v14 }
  0xfe   :  { %2559 = vmatmul.bf16.gmra.mxu1 %v3277_v15  ;;  %v4794_v28 = vadd.f32 %v2361_v57, %v2313_v21  ;;  %v4375_v15 = vld [vmem:[#allocation2 + $0x1cc] sm:$0xf]  ;;  %v4376_v21 = vld [vmem:[#allocation2 + $0x1d4] sm:$0xf] }
  0xff   :  { %v2217_v62 = vpop.f32.mrf.mxu2  ;;  %v4568_v14 = vld [vmem:[#allocation5 + $0x350] sm:$0xff] }
 0x100   :  { %v2266_v29 = vpop.f32.mrf.mxu3  ;;  %v2218_v30 = vadd.f32 %v2217_v62, %v4766_v18  ;;  %2747 = vmatpush.bf16.msrb.mxu1 %v4568_v14  ;;  %v3634_v14 = vld [vmem:[#allocation2 + $0x3c8] sm:$0xf0] }
 0x101   :  { %v2317_v32 = vpop.f32.mrf.mxu0 }
 0x102   :  { %v2267_v31 = vadd.f32 %v2266_v29, %v2218_v30  ;;  %v3409_v29 = vor.u32 %v4384_v12, %v3408_v11  ;;  %v3413_v30 = vor.u32 %v4375_v15, %v3410_v16  ;;  %v4543_v15 = vld [vmem:[#allocation5 + $0x288] sm:$0xff] }
 0x103   :  { %v2366_v33 = vpop.f32.mrf.mxu1  ;;  %v4551_v16 = vld [vmem:[#allocation5 + $0x2c8] sm:$0xff]  ;;  %2601 = vmatpush.bf16.msrb.mxu2 %v4543_v15 }
 0x104   :  { %v2316_v34 = vadd.f32 %v2315_v17, %v2267_v31  ;;  %v3416_v17 = vld [vmem:[#allocation2 + $0x1d0] sm:$0xf]  ;;  %2650 = vmatpush.bf16.msrb.mxu3 %v4551_v16 }
 0x106   :  { %v4797_v47 = vadd.f32 %v2364_v19, %v2316_v34  ;;  %v4385_v19 = vld [vmem:[#allocation2 + $0x214] sm:$0xf0] }
 0x107   :  { %v2219_v48 = vpop.f32.mrf.mxu2  ;;  %v3417_v31 = vor.u32 %v4385_v19, %v3416_v17 }
 0x108   :  { %v2268_v49 = vpop.f32.mrf.mxu3  ;;  %v2220_v18 = vadd.f32 %v2219_v48, %v4770_v26 }
 0x109   :  { %v2320_v58 = vpop.f32.mrf.mxu0 }
 0x10a   :  { %v2269_v57 = vadd.f32 %v2268_v49, %v2220_v18 }
 0x10b   :  { %v2369_v60 = vpop.f32.mrf.mxu1 }
 0x10c   :  { %v2318_v61 = vadd.f32 %v2317_v32, %v2269_v57  ;;  %2417 = vmatmul.bf16.gmra.mxu2 %v3337_v50  ;;  %2515 = vmatmul.bf16.gmra.mxu0 %v3345_v53  ;;  %v3421_v32 = vor.u32 %v4376_v21, %v3418_v22  ;;  %v3480_v50 = vld [vmem:[#allocation2 + $0x258] sm:$0xf]  ;;  %v4560_v53 = vld [vmem:[#allocation5 + $0x310] sm:$0xff]  ;;  %v3482_v57 = vld [vmem:[#allocation2 + $0x2a0] sm:$0xf0] }
 0x10d   :  { %2466 = vmatmul.bf16.gmra.mxu3 %v3341_v52  ;;  %v4402_v52 = vld [vmem:[#allocation2 + $0x29c] sm:$0xf0]  ;;  %2698 = vmatpush.bf16.msrb.mxu0 %v4560_v53  ;;  %v4567_v53 = vld [vmem:[#allocation5 + $0x348] sm:$0xff] }
 0x10e   :  { %2564 = vmatmul.bf16.gmra.mxu1 %v3349_v56  ;;  %v4800_v2 = vadd.f32 %v2366_v33, %v2318_v61  ;;  %v4393_v56 = vld [vmem:[#allocation2 + $0x25c] sm:$0xf]  ;;  %v4394_v61 = vld [vmem:[#allocation2 + $0x264] sm:$0xf] }
 0x10f   :  { %v2222_v26 = vpop.f32.mrf.mxu2  ;;  %2748 = vmatpush.bf16.msrb.mxu1 %v4567_v53  ;;  %v3706_v53 = vld [vmem:[#allocation2 + $0x458] sm:$0xf0] }
 0x110   :  { %v2271_v3 = vpop.f32.mrf.mxu3  ;;  %v2223_v4 = vadd.f32 %v2222_v26, %v4774_v46 }
 0x111   :  { %v2322_v8 = vpop.f32.mrf.mxu0 }
 0x112   :  { %v2272_v6 = vadd.f32 %v2271_v3, %v2223_v4  ;;  %v3481_v3 = vor.u32 %v4402_v52, %v3480_v50  ;;  %v3485_v4 = vor.u32 %v4393_v56, %v3482_v57  ;;  %v4542_v56 = vld [vmem:[#allocation5 + $0x280] sm:$0xff] }
 0x113   :  { %v2371_v9 = vpop.f32.mrf.mxu1  ;;  %v4550_v57 = vld [vmem:[#allocation5 + $0x2c0] sm:$0xff]  ;;  %2602 = vmatpush.bf16.msrb.mxu2 %v4542_v56 }
 0x114   :  { %v2321_v54 = vadd.f32 %v2320_v58, %v2272_v6  ;;  %v3488_v58 = vld [vmem:[#allocation2 + $0x260] sm:$0xf]  ;;  %2651 = vmatpush.bf16.msrb.mxu3 %v4550_v57 }
 0x116   :  { %v4803_v25 = vadd.f32 %v2369_v60, %v2321_v54  ;;  %v4403_v60 = vld [vmem:[#allocation2 + $0x2a4] sm:$0xf0] }
 0x117   :  { %v2224_v27 = vpop.f32.mrf.mxu2  ;;  %v3489_v6 = vor.u32 %v4403_v60, %v3488_v58 }
 0x118   :  { %v2273_v62 = vpop.f32.mrf.mxu3  ;;  %v2225_v46 = vadd.f32 %v2224_v27, %v4778_v55 }
 0x119   :  { %v2325_v34 = vpop.f32.mrf.mxu0 }
 0x11a   :  { %v2274_v33 = vadd.f32 %v2273_v62, %v2225_v46 }
 0x11b   :  { %v2374_v35 = vpop.f32.mrf.mxu1 }
 0x11c   :  { %v2323_v36 = vadd.f32 %v2322_v8, %v2274_v33  ;;  %2422 = vmatmul.bf16.gmra.mxu2 %v3409_v29  ;;  %2520 = vmatmul.bf16.gmra.mxu0 %v3417_v31  ;;  %v3493_v8 = vor.u32 %v4394_v61, %v3490_v63  ;;  %v3552_v29 = vld [vmem:[#allocation2 + $0x2e8] sm:$0xf]  ;;  %v3554_v33 = vld [vmem:[#allocation2 + $0x330] sm:$0xf0] }
 0x11d   :  { %2471 = vmatmul.bf16.gmra.mxu3 %v3413_v30  ;;  %v4420_v30 = vld [vmem:[#allocation2 + $0x32c] sm:$0xf0]  ;;  %v4559_v31 = vld [vmem:[#allocation5 + $0x308] sm:$0xff] }
 0x11e   :  { %2569 = vmatmul.bf16.gmra.mxu1 %v3421_v32  ;;  %v4806_v42 = vadd.f32 %v2371_v9, %v2323_v36  ;;  %v4411_v32 = vld [vmem:[#allocation2 + $0x2ec] sm:$0xf]  ;;  %v4412_v36 = vld [vmem:[#allocation2 + $0x2f4] sm:$0xf]  ;;  %2699 = vmatpush.bf16.msrb.mxu0 %v4559_v31 }
 0x11f   :  { %v2227_v55 = vpop.f32.mrf.mxu2 }
 0x120   :  { %v2276_v43 = vpop.f32.mrf.mxu3  ;;  %v2228_v44 = vadd.f32 %v2227_v55, %v4782_v13 }
 0x121   :  { %v2327_v48 = vpop.f32.mrf.mxu0 }
 0x122   :  { %v2277_v45 = vadd.f32 %v2276_v43, %v2228_v44  ;;  %v3553_v43 = vor.u32 %v4420_v30, %v3552_v29  ;;  %v3557_v44 = vor.u32 %v4411_v32, %v3554_v33  ;;  %v4566_v30 = vld [vmem:[#allocation5 + $0x340] sm:$0xff]  ;;  %v4581_v32 = vld [vmem:[#allocation5 + $0x3b8] sm:$0xff] }
 0x123   :  { %v2376_v49 = vpop.f32.mrf.mxu1  ;;  %v4589_v33 = vld [vmem:[#allocation5 + $0x3f8] sm:$0xff]  ;;  %2749 = vmatpush.bf16.msrb.mxu1 %v4566_v30  ;;  %2791 = vmatpush.bf16.msra.mxu2 %v4581_v32  ;;  %v4324_v30 = vld [vmem:[#allocation2 + $0x34] sm:$0xf] }
 0x124   :  { %v2326_v18 = vadd.f32 %v2325_v34, %v2277_v45  ;;  %v3560_v34 = vld [vmem:[#allocation2 + $0x2f0] sm:$0xf]  ;;  %2840 = vmatpush.bf16.msra.mxu3 %v4589_v33 }
 0x126   :  { %v4809_v0 = vadd.f32 %v2374_v35, %v2326_v18  ;;  %v4421_v35 = vld [vmem:[#allocation2 + $0x334] sm:$0xf0] }
 0x127   :  { %v2229_v1 = vpop.f32.mrf.mxu2  ;;  %v3561_v45 = vor.u32 %v4421_v35, %v3560_v34 }
 0x128   :  { %v2278_v26 = vpop.f32.mrf.mxu3  ;;  %v2230_v13 = vadd.f32 %v2229_v1, %v4786_v24 }
 0x129   :  { %v2330_v54 = vpop.f32.mrf.mxu0 }
 0x12a   :  { %v2279_v9 = vadd.f32 %v2278_v26, %v2230_v13 }
 0x12b   :  { %v2379_v11 = vpop.f32.mrf.mxu1 }
 0x12c   :  { %v2328_v12 = vadd.f32 %v2327_v48, %v2279_v9  ;;  %2427 = vmatmul.bf16.gmra.mxu2 %v3481_v3  ;;  %2525 = vmatmul.bf16.gmra.mxu0 %v3489_v6  ;;  %v3565_v48 = vor.u32 %v4412_v36, %v3562_v39  ;;  %v3624_v3 = vld [vmem:[#allocation2 + $0x378] sm:$0xf]  ;;  %v4558_v6 = vld [vmem:[#allocation5 + $0x300] sm:$0xff] }
 0x12d   :  { %2476 = vmatmul.bf16.gmra.mxu3 %v3485_v4  ;;  %v4438_v4 = vld [vmem:[#allocation2 + $0x3bc] sm:$0xf0]  ;;  %v3626_v9 = vld [vmem:[#allocation2 + $0x3c0] sm:$0xf0]  ;;  %2700 = vmatpush.bf16.msrb.mxu0 %v4558_v6  ;;  %v4605_v6 = vld [vmem:[#allocation5 + $0x478] sm:$0xff] }
 0x12e   :  { %2574 = vmatmul.bf16.gmra.mxu1 %v3493_v8  ;;  %v4812_v17 = vadd.f32 %v2376_v49, %v2328_v12  ;;  %v4429_v8 = vld [vmem:[#allocation2 + $0x37c] sm:$0xf]  ;;  %v4430_v12 = vld [vmem:[#allocation2 + $0x384] sm:$0xf] }
 0x12f   :  { %v2232_v24 = vpop.f32.mrf.mxu2  ;;  %2938 = vmatpush.bf16.msra.mxu1 %v4605_v6  ;;  %v3290_v6 = vld [vmem:[#allocation2 + $0x108] sm:$0xf0] }
 0x130   :  { %v2281_v19 = vpop.f32.mrf.mxu3  ;;  %v2233_v21 = vadd.f32 %v2232_v24, %v4760_v59 }
 0x131   :  { %v2332_v27 = vpop.f32.mrf.mxu0 }
 0x132   :  { %v2282_v22 = vadd.f32 %v2281_v19, %v2233_v21  ;;  %v3625_v19 = vor.u32 %v4438_v4, %v3624_v3  ;;  %v3629_v21 = vor.u32 %v4429_v8, %v3626_v9  ;;  %v4580_v8 = vld [vmem:[#allocation5 + $0x3b0] sm:$0xff] }
 0x133   :  { %v2381_v62 = vpop.f32.mrf.mxu1  ;;  %v4588_v9 = vld [vmem:[#allocation5 + $0x3f0] sm:$0xff]  ;;  %2792 = vmatpush.bf16.msra.mxu2 %v4580_v8 }
 0x134   :  { %v2331_v46 = vadd.f32 %v2330_v54, %v2282_v22  ;;  %v3632_v54 = vld [vmem:[#allocation2 + $0x380] sm:$0xf]  ;;  %2841 = vmatpush.bf16.msra.mxu3 %v4588_v9 }
 0x136   :  { %v4815_v40 = vadd.f32 %v2379_v11, %v2331_v46  ;;  %v4439_v11 = vld [vmem:[#allocation2 + $0x3c4] sm:$0xf0] }
 0x137   :  { %v2234_v41 = vpop.f32.mrf.mxu2  ;;  %v3633_v22 = vor.u32 %v4439_v11, %v3632_v54 }
 0x138   :  { %v2283_v55 = vpop.f32.mrf.mxu3  ;;  %v2235_v59 = vadd.f32 %v2234_v41, %v4764_v10 }
 0x139   :  { %v2335_v18 = vpop.f32.mrf.mxu0 }
 0x13a   :  { %v2284_v49 = vadd.f32 %v2283_v55, %v2235_v59 }
 0x13b   :  { %v2384_v50 = vpop.f32.mrf.mxu1 }
 0x13c   :  { %v2333_v52 = vadd.f32 %v2332_v27, %v2284_v49  ;;  %2432 = vmatmul.bf16.gmra.mxu2 %v3553_v43  ;;  %2530 = vmatmul.bf16.gmra.mxu0 %v3561_v45  ;;  %v3637_v27 = vor.u32 %v4430_v12, %v3634_v14  ;;  %v3696_v43 = vld [vmem:[#allocation2 + $0x408] sm:$0xf]  ;;  %v4597_v45 = vld [vmem:[#allocation5 + $0x438] sm:$0xff]  ;;  %v3698_v49 = vld [vmem:[#allocation2 + $0x450] sm:$0xf0] }
 0x13d   :  { %2481 = vmatmul.bf16.gmra.mxu3 %v3557_v44  ;;  %v4456_v44 = vld [vmem:[#allocation2 + $0x44c] sm:$0xf0]  ;;  %2889 = vmatpush.bf16.msra.mxu0 %v4597_v45 }
 0x13e   :  { %2579 = vmatmul.bf16.gmra.mxu1 %v3565_v48  ;;  %v4818_v58 = vadd.f32 %v2381_v62, %v2333_v52  ;;  %v4447_v48 = vld [vmem:[#allocation2 + $0x40c] sm:$0xf]  ;;  %v4448_v52 = vld [vmem:[#allocation2 + $0x414] sm:$0xf] }
 0x13f   :  { %v2237_v10 = vpop.f32.mrf.mxu2  ;;  %v4604_v45 = vld [vmem:[#allocation5 + $0x470] sm:$0xff] }
 0x140   :  { %v2286_v60 = vpop.f32.mrf.mxu3  ;;  %v2238_v61 = vadd.f32 %v2237_v10, %v4768_v23  ;;  %2939 = vmatpush.bf16.msra.mxu1 %v4604_v45  ;;  %v3362_v45 = vld [vmem:[#allocation2 + $0x198] sm:$0xf0] }
 0x141   :  { %v2337_v1 = vpop.f32.mrf.mxu0 }
 0x142   :  { %v2287_v63 = vadd.f32 %v2286_v60, %v2238_v61  ;;  %v3697_v60 = vor.u32 %v4456_v44, %v3696_v43  ;;  %v3701_v61 = vor.u32 %v4447_v48, %v3698_v49  ;;  %v4579_v48 = vld [vmem:[#allocation5 + $0x3a8] sm:$0xff] }
 0x143   :  { %v2386_v26 = vpop.f32.mrf.mxu1  ;;  %v4587_v49 = vld [vmem:[#allocation5 + $0x3e8] sm:$0xff]  ;;  %2793 = vmatpush.bf16.msra.mxu2 %v4579_v48 }
 0x144   :  { %v2336_v13 = vadd.f32 %v2335_v18, %v2287_v63  ;;  %v3704_v18 = vld [vmem:[#allocation2 + $0x410] sm:$0xf]  ;;  %2842 = vmatpush.bf16.msra.mxu3 %v4587_v49 }
 0x146   :  { %v4821_v15 = vadd.f32 %v2384_v50, %v2336_v13  ;;  %v4457_v50 = vld [vmem:[#allocation2 + $0x454] sm:$0xf0] }
 0x147   :  { %v2239_v16 = vpop.f32.mrf.mxu2  ;;  %v3705_v63 = vor.u32 %v4457_v50, %v3704_v18 }
 0x148   :  { %v2288_v24 = vpop.f32.mrf.mxu3  ;;  %v2240_v23 = vadd.f32 %v2239_v16, %v4772_v38 }
 0x149   :  { %v2340_v46 = vpop.f32.mrf.mxu0 }
 0x14a   :  { %v2289_v62 = vadd.f32 %v2288_v24, %v2240_v23 }
 0x14b   :  { %v2389_v29 = vpop.f32.mrf.mxu1 }
 0x14c   :  { %v2338_v31 = vadd.f32 %v2337_v1, %v2289_v62  ;;  %2437 = vmatmul.bf16.gmra.mxu2 %v3625_v19  ;;  %2535 = vmatmul.bf16.gmra.mxu0 %v3633_v22  ;;  %v3709_v1 = vor.u32 %v4448_v52, %v3706_v53  ;;  %v3208_v19 = vld [vmem:[#allocation2 + $0x28] sm:$0xf]  ;;  %v4596_v22 = vld [vmem:[#allocation5 + $0x430] sm:$0xff] }
 0x14d   :  { %2486 = vmatmul.bf16.gmra.mxu3 %v3629_v21  ;;  %v4332_v21 = vld [vmem:[#allocation2 + $0x6c] sm:$0xf0]  ;;  %v3210_v62 = vld [vmem:[#allocation2 + $0x70] sm:$0xf0]  ;;  %2890 = vmatpush.bf16.msra.mxu0 %v4596_v22  ;;  %v4603_v22 = vld [vmem:[#allocation5 + $0x468] sm:$0xff] }
 0x14e   :  { %2584 = vmatmul.bf16.gmra.mxu1 %v3637_v27  ;;  %v4824_v34 = vadd.f32 %v2386_v26, %v2338_v31  ;;  %v4323_v27 = vld [vmem:[#allocation2 + $0x2c] sm:$0xf]  ;;  %v3218_v31 = vld [vmem:[#allocation2 + $0x78] sm:$0xf0] }
 0x14f   :  { %v2242_v38 = vpop.f32.mrf.mxu2  ;;  %2940 = vmatpush.bf16.msra.mxu1 %v4603_v22  ;;  %v3434_v22 = vld [vmem:[#allocation2 + $0x228] sm:$0xf0] }
 0x150   :  { %v2291_v35 = vpop.f32.mrf.mxu3  ;;  %v2243_v36 = vadd.f32 %v2242_v38, %v4776_v51 }
 0x151   :  { %v2342_v41 = vpop.f32.mrf.mxu0 }
 0x152   :  { %v2292_v39 = vadd.f32 %v2291_v35, %v2243_v36  ;;  %v3209_v35 = vor.u32 %v4332_v21, %v3208_v19  ;;  %v3213_v36 = vor.u32 %v4323_v27, %v3210_v62  ;;  %v4578_v27 = vld [vmem:[#allocation5 + $0x3a0] sm:$0xff] }
 0x153   :  { %v2391_v55 = vpop.f32.mrf.mxu1  ;;  %v4586_v62 = vld [vmem:[#allocation5 + $0x3e0] sm:$0xff]  ;;  %2794 = vmatpush.bf16.msra.mxu2 %v4578_v27 }
 0x154   :  { %v2341_v59 = vadd.f32 %v2340_v46, %v2292_v39  ;;  %v3216_v46 = vld [vmem:[#allocation2 + $0x30] sm:$0xf]  ;;  %2843 = vmatpush.bf16.msra.mxu3 %v4586_v62 }
 0x156   :  { %v4827_v56 = vadd.f32 %v2389_v29, %v2341_v59  ;;  %v4333_v29 = vld [vmem:[#allocation2 + $0x74] sm:$0xf0] }
 0x157   :  { %v2244_v57 = vpop.f32.mrf.mxu2  ;;  %v3217_v39 = vor.u32 %v4333_v29, %v3216_v46 }
 0x158   :  { %v2293_v10 = vpop.f32.mrf.mxu3  ;;  %v2245_v51 = vadd.f32 %v2244_v57, %v4780_v5 }
 0x159   :  { %v2345_v13 = vpop.f32.mrf.mxu0 }
 0x15a   :  { %v2294_v26 = vadd.f32 %v2293_v10, %v2245_v51 }
 0x15b   :  { %v2394_v3 = vpop.f32.mrf.mxu1 }
 0x15c   :  { %v2343_v4 = vadd.f32 %v2342_v41, %v2294_v26  ;;  %2442 = vmatmul.bf16.gmra.mxu2 %v3697_v60  ;;  %2540 = vmatmul.bf16.gmra.mxu0 %v3705_v63  ;;  %v3221_v41 = vor.u32 %v4324_v30, %v3218_v31  ;;  %v3280_v60 = vld [vmem:[#allocation2 + $0xb8] sm:$0xf]  ;;  %v4595_v63 = vld [vmem:[#allocation5 + $0x428] sm:$0xff]  ;;  %v3282_v26 = vld [vmem:[#allocation2 + $0x100] sm:$0xf0] }
 0x15d   :  { %2491 = vmatmul.bf16.gmra.mxu3 %v3701_v61  ;;  %v4350_v61 = vld [vmem:[#allocation2 + $0xfc] sm:$0xf0]  ;;  %2891 = vmatpush.bf16.msra.mxu0 %v4595_v63 }
 0x15e   :  { %2589 = vmatmul.bf16.gmra.mxu1 %v3709_v1  ;;  %v4830_v54 = vadd.f32 %v2391_v55, %v2343_v4  ;;  %v4341_v1 = vld [vmem:[#allocation2 + $0xbc] sm:$0xf]  ;;  %v4342_v4 = vld [vmem:[#allocation2 + $0xc4] sm:$0xf] }
 0x15f   :  { %v2247_v5 = vpop.f32.mrf.mxu2  ;;  %v4602_v63 = vld [vmem:[#allocation5 + $0x460] sm:$0xff] }
 0x160   :  { %v2296_v11 = vpop.f32.mrf.mxu3  ;;  %v2248_v12 = vadd.f32 %v2247_v5, %v4784_v20  ;;  %2941 = vmatpush.bf16.msra.mxu1 %v4602_v63  ;;  %v3506_v63 = vld [vmem:[#allocation2 + $0x2b8] sm:$0xf0] }
 0x161   :  { %v2347_v16 = vpop.f32.mrf.mxu0 }
 0x162   :  { %v2297_v14 = vadd.f32 %v2296_v11, %v2248_v12  ;;  %v3281_v11 = vor.u32 %v4350_v61, %v3280_v60  ;;  %v3285_v12 = vor.u32 %v4341_v1, %v3282_v26  ;;  %v4577_v1 = vld [vmem:[#allocation5 + $0x398] sm:$0xff] }
 0x163   :  { %v2396_v24 = vpop.f32.mrf.mxu1  ;;  %v4585_v26 = vld [vmem:[#allocation5 + $0x3d8] sm:$0xff]  ;;  %2795 = vmatpush.bf16.msra.mxu2 %v4577_v1 }
 0x164   :  { %v2346_v23 = vadd.f32 %v2345_v13, %v2297_v14  ;;  %v3288_v13 = vld [vmem:[#allocation2 + $0xc0] sm:$0xf]  ;;  %2844 = vmatpush.bf16.msra.mxu3 %v4585_v26 }
 0x166   :  { %v4833_v32 = vadd.f32 %v2394_v3, %v2346_v23  ;;  %v4351_v3 = vld [vmem:[#allocation2 + $0x104] sm:$0xf0] }
 0x167   :  { %v2249_v33 = vpop.f32.mrf.mxu2  ;;  %v3289_v14 = vor.u32 %v4351_v3, %v3288_v13 }
 0x168   :  { %v2298_v38 = vpop.f32.mrf.mxu3  ;;  %v2250_v20 = vadd.f32 %v2249_v33, %v4788_v37 }
 0x169   :  { %v2506_v59 = vpop.f32.mrf.mxu0 }
 0x16a   :  { %v2299_v55 = vadd.f32 %v2298_v38, %v2250_v20 }
 0x16b   :  { %v2555_v43 = vpop.f32.mrf.mxu1 }
 0x16c   :  { %v2348_v44 = vadd.f32 %v2347_v16, %v2299_v55  ;;  %2603 = vmatmul.bf16.vlgmr.msrb.gmra.mxu2 %v3209_v35  ;;  %2701 = vmatmul.bf16.vlgmr.msrb.gmra.mxu0 %v3217_v39  ;;  %v3293_v16 = vor.u32 %v4342_v4, %v3290_v6  ;;  %v3352_v35 = vld [vmem:[#allocation2 + $0x148] sm:$0xf]  ;;  %v4594_v39 = vld [vmem:[#allocation5 + $0x420] sm:$0xff]  ;;  %v3354_v55 = vld [vmem:[#allocation2 + $0x190] sm:$0xf0] }
 0x16d   :  { %2652 = vmatmul.bf16.vlgmr.msrb.gmra.mxu3 %v3213_v36  ;;  %v4368_v36 = vld [vmem:[#allocation2 + $0x18c] sm:$0xf0]  ;;  %2892 = vmatpush.bf16.msra.mxu0 %v4594_v39  ;;  %v4601_v39 = vld [vmem:[#allocation5 + $0x458] sm:$0xff] }
 0x16e   :  { %2750 = vmatmul.bf16.vlgmr.msrb.gmra.mxu1 %v3221_v41  ;;  %v4836_v18 = vadd.f32 %v2396_v24, %v2348_v44  ;;  %v4359_v41 = vld [vmem:[#allocation2 + $0x14c] sm:$0xf]  ;;  %v4360_v44 = vld [vmem:[#allocation2 + $0x154] sm:$0xf] }
 0x16f   :  { %v2408_v37 = vpop.f32.mrf.mxu2  ;;  %2942 = vmatpush.bf16.msra.mxu1 %v4601_v39  ;;  %v3578_v39 = vld [vmem:[#allocation2 + $0x348] sm:$0xf0] }
 0x170   :  { %v2457_v50 = vpop.f32.mrf.mxu3  ;;  %v2409_v52 = vadd.f32 %v2408_v37, %v4791_v7 }
 0x171   :  { %v2508_v57 = vpop.f32.mrf.mxu0 }
 0x172   :  { %v2458_v53 = vadd.f32 %v2457_v50, %v2409_v52  ;;  %v3353_v50 = vor.u32 %v4368_v36, %v3352_v35  ;;  %v3357_v52 = vor.u32 %v4359_v41, %v3354_v55  ;;  %v4576_v41 = vld [vmem:[#allocation5 + $0x390] sm:$0xff] }
 0x173   :  { %v2557_v10 = vpop.f32.mrf.mxu1  ;;  %v4584_v55 = vld [vmem:[#allocation5 + $0x3d0] sm:$0xff]  ;;  %2796 = vmatpush.bf16.msra.mxu2 %v4576_v41 }
 0x174   :  { %v2507_v51 = vadd.f32 %v2506_v59, %v2458_v53  ;;  %v3360_v59 = vld [vmem:[#allocation2 + $0x150] sm:$0xf]  ;;  %2845 = vmatpush.bf16.msra.mxu3 %v4584_v55 }
 0x176   :  { %v4839_v8 = vadd.f32 %v2555_v43, %v2507_v51  ;;  %v4369_v43 = vld [vmem:[#allocation2 + $0x194] sm:$0xf0] }
 0x177   :  { %v2410_v9 = vpop.f32.mrf.mxu2  ;;  %v3361_v53 = vor.u32 %v4369_v43, %v3360_v59 }
 0x178   :  { %v2459_v5 = vpop.f32.mrf.mxu3  ;;  %v2411_v7 = vadd.f32 %v2410_v9, %v4794_v28 }
 0x179   :  { %v2511_v23 = vpop.f32.mrf.mxu0 }
 0x17a   :  { %v2460_v24 = vadd.f32 %v2459_v5, %v2411_v7 }
 0x17b   :  { %v2560_v19 = vpop.f32.mrf.mxu1 }
 0x17c   :  { %v2509_v21 = vadd.f32 %v2508_v57, %v2460_v24  ;;  %2608 = vmatmul.bf16.gmra.mxu2 %v3281_v11  ;;  %2706 = vmatmul.bf16.gmra.mxu0 %v3289_v14  ;;  %v3365_v57 = vor.u32 %v4360_v44, %v3362_v45  ;;  %v3424_v11 = vld [vmem:[#allocation2 + $0x1d8] sm:$0xf]  ;;  %v3426_v24 = vld [vmem:[#allocation2 + $0x220] sm:$0xf0] }
 0x17d   :  { %2657 = vmatmul.bf16.gmra.mxu3 %v3285_v12  ;;  %v4386_v12 = vld [vmem:[#allocation2 + $0x21c] sm:$0xf0]  ;;  %v4593_v14 = vld [vmem:[#allocation5 + $0x418] sm:$0xff] }
 0x17e   :  { %2755 = vmatmul.bf16.gmra.mxu1 %v3293_v16  ;;  %v4842_v46 = vadd.f32 %v2557_v10, %v2509_v21  ;;  %v4377_v16 = vld [vmem:[#allocation2 + $0x1dc] sm:$0xf]  ;;  %v4378_v21 = vld [vmem:[#allocation2 + $0x1e4] sm:$0xf]  ;;  %2893 = vmatpush.bf16.msra.mxu0 %v4593_v14  ;;  %v4600_v14 = vld [vmem:[#allocation5 + $0x450] sm:$0xff] }
 0x17f   :  { %v2413_v28 = vpop.f32.mrf.mxu2  ;;  %2943 = vmatpush.bf16.msra.mxu1 %v4600_v14  ;;  %v3650_v14 = vld [vmem:[#allocation2 + $0x3d8] sm:$0xf0] }
 0x180   :  { %v2462_v29 = vpop.f32.mrf.mxu3  ;;  %v2414_v30 = vadd.f32 %v2413_v28, %v4797_v47 }
 0x181   :  { %v2513_v33 = vpop.f32.mrf.mxu0 }
 0x182   :  { %v2463_v31 = vadd.f32 %v2462_v29, %v2414_v30  ;;  %v3425_v29 = vor.u32 %v4386_v12, %v3424_v11  ;;  %v3429_v30 = vor.u32 %v4377_v16, %v3426_v24  ;;  %v4575_v16 = vld [vmem:[#allocation5 + $0x388] sm:$0xff] }
 0x183   :  { %v2562_v38 = vpop.f32.mrf.mxu1  ;;  %v4583_v24 = vld [vmem:[#allocation5 + $0x3c8] sm:$0xff]  ;;  %2797 = vmatpush.bf16.msra.mxu2 %v4575_v16 }
 0x184   :  { %v2512_v20 = vadd.f32 %v2511_v23, %v2463_v31  ;;  %v3432_v23 = vld [vmem:[#allocation2 + $0x1e0] sm:$0xf]  ;;  %2846 = vmatpush.bf16.msra.mxu3 %v4583_v24 }
 0x186   :  { %v4845_v48 = vadd.f32 %v2560_v19, %v2512_v20  ;;  %v4387_v19 = vld [vmem:[#allocation2 + $0x224] sm:$0xf0] }
 0x187   :  { %v2415_v49 = vpop.f32.mrf.mxu2  ;;  %v3433_v31 = vor.u32 %v4387_v19, %v3432_v23 }
 0x188   :  { %v2464_v37 = vpop.f32.mrf.mxu3  ;;  %v2416_v47 = vadd.f32 %v2415_v49, %v4800_v2 }
 0x189   :  { %v2516_v51 = vpop.f32.mrf.mxu0 }
 0x18a   :  { %v2465_v10 = vadd.f32 %v2464_v37, %v2416_v47 }
 0x18b   :  { %v2565_v60 = vpop.f32.mrf.mxu1 }
 0x18c   :  { %v2514_v61 = vadd.f32 %v2513_v33, %v2465_v10  ;;  %2613 = vmatmul.bf16.gmra.mxu2 %v3353_v50  ;;  %2711 = vmatmul.bf16.gmra.mxu0 %v3361_v53  ;;  %v3437_v33 = vor.u32 %v4378_v21, %v3434_v22  ;;  %v3496_v50 = vld [vmem:[#allocation2 + $0x268] sm:$0xf]  ;;  %v4592_v53 = vld [vmem:[#allocation5 + $0x410] sm:$0xff] }
 0x18d   :  { %2662 = vmatmul.bf16.gmra.mxu3 %v3357_v52  ;;  %v4404_v52 = vld [vmem:[#allocation2 + $0x2ac] sm:$0xf0]  ;;  %v3498_v10 = vld [vmem:[#allocation2 + $0x2b0] sm:$0xf0]  ;;  %2894 = vmatpush.bf16.msra.mxu0 %v4592_v53  ;;  %v4599_v53 = vld [vmem:[#allocation5 + $0x448] sm:$0xff] }
 0x18e   :  { %2760 = vmatmul.bf16.gmra.mxu1 %v3365_v57  ;;  %v4848_v13 = vadd.f32 %v2562_v38, %v2514_v61  ;;  %v4395_v57 = vld [vmem:[#allocation2 + $0x26c] sm:$0xf]  ;;  %v4396_v61 = vld [vmem:[#allocation2 + $0x274] sm:$0xf] }
 0x18f   :  { %v2418_v2 = vpop.f32.mrf.mxu2  ;;  %2944 = vmatpush.bf16.msra.mxu1 %v4599_v53 }
 0x190   :  { %v2467_v3 = vpop.f32.mrf.mxu3  ;;  %v2419_v4 = vadd.f32 %v2418_v2, %v4803_v25 }
 0x191   :  { %v2518_v9 = vpop.f32.mrf.mxu0 }
 0x192   :  { %v2468_v6 = vadd.f32 %v2467_v3, %v2419_v4  ;;  %v3497_v3 = vor.u32 %v4404_v52, %v3496_v50  ;;  %v3501_v4 = vor.u32 %v4395_v57, %v3498_v10  ;;  %v4574_v57 = vld [vmem:[#allocation5 + $0x380] sm:$0xff] }
 0x193   :  { %v2567_v5 = vpop.f32.mrf.mxu1  ;;  %v4582_v10 = vld [vmem:[#allocation5 + $0x3c0] sm:$0xff]  ;;  %2798 = vmatpush.bf16.msra.mxu2 %v4574_v57 }
 0x194   :  { %v2517_v7 = vadd.f32 %v2516_v51, %v2468_v6  ;;  %v3504_v51 = vld [vmem:[#allocation2 + $0x270] sm:$0xf]  ;;  %2847 = vmatpush.bf16.msra.mxu3 %v4582_v10 }
 0x196   :  { %v4851_v27 = vadd.f32 %v2565_v60, %v2517_v7  ;;  %v4405_v60 = vld [vmem:[#allocation2 + $0x2b4] sm:$0xf0] }
 0x197   :  { %v2420_v62 = vpop.f32.mrf.mxu2  ;;  %v3505_v6 = vor.u32 %v4405_v60, %v3504_v51 }
 0x198   :  { %v2469_v28 = vpop.f32.mrf.mxu3  ;;  %v2421_v25 = vadd.f32 %v2420_v62, %v4806_v42 }
 0x199   :  { %v2521_v20 = vpop.f32.mrf.mxu0 }
 0x19a   :  { %v2470_v38 = vadd.f32 %v2469_v28, %v2421_v25 }
 0x19b   :  { %v2570_v35 = vpop.f32.mrf.mxu1 }
 0x19c   :  { %v2519_v36 = vadd.f32 %v2518_v9, %v2470_v38  ;;  %2618 = vmatmul.bf16.gmra.mxu2 %v3425_v29  ;;  %2716 = vmatmul.bf16.gmra.mxu0 %v3433_v31  ;;  %v3509_v9 = vor.u32 %v4396_v61, %v3506_v63  ;;  %v3568_v29 = vld [vmem:[#allocation2 + $0x2f8] sm:$0xf]  ;;  %v4591_v31 = vld [vmem:[#allocation5 + $0x408] sm:$0xff]  ;;  %v3570_v38 = vld [vmem:[#allocation2 + $0x340] sm:$0xf0] }
 0x19d   :  { %2667 = vmatmul.bf16.gmra.mxu3 %v3429_v30  ;;  %v4422_v30 = vld [vmem:[#allocation2 + $0x33c] sm:$0xf0]  ;;  %2895 = vmatpush.bf16.msra.mxu0 %v4591_v31 }
 0x19e   :  { %2765 = vmatmul.bf16.gmra.mxu1 %v3437_v33  ;;  %v4854_v59 = vadd.f32 %v2567_v5, %v2519_v36  ;;  %v4413_v33 = vld [vmem:[#allocation2 + $0x2fc] sm:$0xf]  ;;  %v4414_v36 = vld [vmem:[#allocation2 + $0x304] sm:$0xf] }
 0x19f   :  { %v2423_v42 = vpop.f32.mrf.mxu2 }
 0x1a0   :  { %v2472_v43 = vpop.f32.mrf.mxu3  ;;  %v2424_v44 = vadd.f32 %v2423_v42, %v4809_v0 }
 0x1a1   :  { %v2523_v49 = vpop.f32.mrf.mxu0 }
 0x1a2   :  { %v2473_v45 = vadd.f32 %v2472_v43, %v2424_v44  ;;  %v3569_v43 = vor.u32 %v4422_v30, %v3568_v29  ;;  %v3573_v44 = vor.u32 %v4413_v33, %v3570_v38  ;;  %v4598_v30 = vld [vmem:[#allocation5 + $0x440] sm:$0xff] }
 0x1a3   :  { %v2572_v37 = vpop.f32.mrf.mxu1  ;;  %2945 = vmatpush.bf16.msra.mxu1 %v4598_v30 }
 0x1a4   :  { %v2522_v47 = vadd.f32 %v2521_v20, %v2473_v45  ;;  %v3576_v20 = vld [vmem:[#allocation2 + $0x300] sm:$0xf] }
 0x1a6   :  { %v4857_v1 = vadd.f32 %v2570_v35, %v2522_v47  ;;  %v4423_v35 = vld [vmem:[#allocation2 + $0x344] sm:$0xf0] }
 0x1a7   :  { %v2425_v26 = vpop.f32.mrf.mxu2  ;;  %v3577_v45 = vor.u32 %v4423_v35, %v3576_v20 }
 0x1a8   :  { %v2474_v2 = vpop.f32.mrf.mxu3  ;;  %v2426_v0 = vadd.f32 %v2425_v26, %v4812_v17 }
 0x1a9   :  { %v2526_v7 = vpop.f32.mrf.mxu0 }
 0x1aa   :  { %v2475_v5 = vadd.f32 %v2474_v2, %v2426_v0 }
 0x1ab   :  { %v2575_v11 = vpop.f32.mrf.mxu1 }
 0x1ac   :  { %v2524_v12 = vadd.f32 %v2523_v49, %v2475_v5  ;;  %2623 = vmatmul.bf16.gmra.mxu2 %v3497_v3  ;;  %2721 = vmatmul.bf16.gmra.mxu0 %v3505_v6  ;;  %v3581_v49 = vor.u32 %v4414_v36, %v3578_v39  ;;  %v3640_v3 = vld [vmem:[#allocation2 + $0x388] sm:$0xf]  ;;  %v4590_v6 = vld [vmem:[#allocation5 + $0x400] sm:$0xff]  ;;  %v3642_v5 = vld [vmem:[#allocation2 + $0x3d0] sm:$0xf0] }
 0x1ad   :  { %2672 = vmatmul.bf16.gmra.mxu3 %v3501_v4  ;;  %v4440_v4 = vld [vmem:[#allocation2 + $0x3cc] sm:$0xf0]  ;;  %2896 = vmatpush.bf16.msra.mxu0 %v4590_v6 }
 0x1ae   :  { %2770 = vmatmul.bf16.gmra.mxu1 %v3509_v9  ;;  %v4860_v23 = vadd.f32 %v2572_v37, %v2524_v12  ;;  %v4431_v9 = vld [vmem:[#allocation2 + $0x38c] sm:$0xf]  ;;  %v4432_v12 = vld [vmem:[#allocation2 + $0x394] sm:$0xf] }
 0x1af   :  { %v2428_v17 = vpop.f32.mrf.mxu2 }
 0x1b0   :  { %v2477_v19 = vpop.f32.mrf.mxu3  ;;  %v2429_v21 = vadd.f32 %v2428_v17, %v4815_v40 }
 0x1b1   :  { %v2528_v62 = vpop.f32.mrf.mxu0 }
 0x1b2   :  { %v2478_v22 = vadd.f32 %v2477_v19, %v2429_v21  ;;  %v3641_v19 = vor.u32 %v4440_v4, %v3640_v3  ;;  %v3645_v21 = vor.u32 %v4431_v9, %v3642_v5 }
 0x1b3   :  { %v2577_v28 = vpop.f32.mrf.mxu1 }
 0x1b4   :  { %v2527_v25 = vadd.f32 %v2526_v7, %v2478_v22  ;;  %v3648_v7 = vld [vmem:[#allocation2 + $0x390] sm:$0xf] }
 0x1b6   :  { %v4863_v41 = vadd.f32 %v2575_v11, %v2527_v25  ;;  %v4441_v11 = vld [vmem:[#allocation2 + $0x3d4] sm:$0xf0] }
 0x1b7   :  { %v2430_v55 = vpop.f32.mrf.mxu2  ;;  %v3649_v22 = vor.u32 %v4441_v11, %v3648_v7  ;;  %v3224_v11 = vld [vmem:[#allocation2 + $0x38] sm:$0xf] }
 0x1b8   :  { %v2479_v42 = vpop.f32.mrf.mxu3  ;;  %v2431_v40 = vadd.f32 %v2430_v55, %v4818_v58 }
 0x1b9   :  { %v2531_v47 = vpop.f32.mrf.mxu0 }
 0x1ba   :  { %v2480_v37 = vadd.f32 %v2479_v42, %v2431_v40  ;;  %v3712_v42 = vld [vmem:[#allocation2 + $0x418] sm:$0xf]  ;;  %v4458_v40 = vld [vmem:[#allocation2 + $0x45c] sm:$0xf0] }
 0x1bb   :  { %v2580_v50 = vpop.f32.mrf.mxu1  ;;  %v3713_v10 = vor.u32 %v4458_v40, %v3712_v42 }
 0x1bc   :  { %v2529_v52 = vadd.f32 %v2528_v62, %v2480_v37  ;;  %2628 = vmatmul.bf16.gmra.mxu2 %v3569_v43  ;;  %2726 = vmatmul.bf16.gmra.mxu0 %v3577_v45  ;;  %v3653_v62 = vor.u32 %v4432_v12, %v3650_v14  ;;  %v4449_v43 = vld [vmem:[#allocation2 + $0x41c] sm:$0xf]  ;;  %v3720_v45 = vld [vmem:[#allocation2 + $0x420] sm:$0xf]  ;;  %v4450_v37 = vld [vmem:[#allocation2 + $0x424] sm:$0xf] }
 0x1bd   :  { %2677 = vmatmul.bf16.gmra.mxu3 %v3573_v44  ;;  %v3714_v44 = vld [vmem:[#allocation2 + $0x460] sm:$0xf0]  ;;  %v4334_v12 = vld [vmem:[#allocation2 + $0x7c] sm:$0xf0]  ;;  %v4325_v14 = vld [vmem:[#allocation2 + $0x3c] sm:$0xf] }
 0x1be   :  { %2775 = vmatmul.bf16.gmra.mxu1 %v3581_v49  ;;  %v4866_v51 = vadd.f32 %v2577_v28, %v2529_v52  ;;  %v4459_v49 = vld [vmem:[#allocation2 + $0x464] sm:$0xf0] }
 0x1bf   :  { %v2433_v58 = vpop.f32.mrf.mxu2 }
 0x1c0   :  { %v2482_v60 = vpop.f32.mrf.mxu3  ;;  %v2434_v61 = vadd.f32 %v2433_v58, %v4821_v15  ;;  %v3721_v58 = vor.u32 %v4459_v49, %v3720_v45  ;;  %v3296_v45 = vld [vmem:[#allocation2 + $0xc8] sm:$0xf]  ;;  %v4352_v49 = vld [vmem:[#allocation2 + $0x10c] sm:$0xf0] }
 0x1c1   :  { %v2533_v26 = vpop.f32.mrf.mxu0 }
 0x1c2   :  { %v2483_v63 = vadd.f32 %v2482_v60, %v2434_v61 }
 0x1c3   :  { %v2582_v2 = vpop.f32.mrf.mxu1 }
 0x1c4   :  { %v2532_v0 = vadd.f32 %v2531_v47, %v2483_v63  ;;  %v3722_v47 = vld [vmem:[#allocation2 + $0x468] sm:$0xf0] }
 0x1c5   :  { %v3725_v60 = vor.u32 %v4450_v37, %v3722_v47  ;;  %v4343_v37 = vld [vmem:[#allocation2 + $0xcc] sm:$0xf]  ;;  %v3298_v47 = vld [vmem:[#allocation2 + $0x110] sm:$0xf0] }
 0x1c6   :  { %v4869_v16 = vadd.f32 %v2580_v50, %v2532_v0 }
 0x1c7   :  { %v2435_v24 = vpop.f32.mrf.mxu2 }
 0x1c8   :  { %v2484_v17 = vpop.f32.mrf.mxu3  ;;  %v2436_v15 = vadd.f32 %v2435_v24, %v4824_v34  ;;  %v3226_v24 = vld [vmem:[#allocation2 + $0x80] sm:$0xf0] }
 0x1c9   :  { %v2536_v25 = vpop.f32.mrf.mxu0 }
 0x1ca   :  { %v2485_v28 = vadd.f32 %v2484_v17, %v2436_v15  ;;  %v3232_v17 = vld [vmem:[#allocation2 + $0x40] sm:$0xf]  ;;  %v4335_v15 = vld [vmem:[#allocation2 + $0x84] sm:$0xf0] }
 0x1cb   :  { %v2585_v29 = vpop.f32.mrf.mxu1  ;;  %v3233_v30 = vor.u32 %v4335_v15, %v3232_v17  ;;  %v3368_v17 = vld [vmem:[#allocation2 + $0x158] sm:$0xf]  ;;  %v4370_v15 = vld [vmem:[#allocation2 + $0x19c] sm:$0xf0] }
 0x1cc   :  { %v2534_v31 = vadd.f32 %v2533_v26, %v2485_v28  ;;  %2633 = vmatmul.bf16.gmra.mxu2 %v3641_v19  ;;  %2731 = vmatmul.bf16.gmra.mxu0 %v3649_v22  ;;  %v4326_v19 = vld [vmem:[#allocation2 + $0x44] sm:$0xf] }
 0x1cd   :  { %2682 = vmatmul.bf16.gmra.mxu3 %v3645_v21  ;;  %v3234_v21 = vld [vmem:[#allocation2 + $0x88] sm:$0xf0] }
 0x1ce   :  { %2780 = vmatmul.bf16.gmra.mxu1 %v3653_v62  ;;  %v4872_v33 = vadd.f32 %v2582_v2, %v2534_v31  ;;  %v3237_v31 = vor.u32 %v4326_v19, %v3234_v21  ;;  %v4361_v19 = vld [vmem:[#allocation2 + $0x15c] sm:$0xf]  ;;  %v3370_v21 = vld [vmem:[#allocation2 + $0x1a0] sm:$0xf0] }
 0x1cf   :  { %v2438_v38 = vpop.f32.mrf.mxu2 }
 0x1d0   :  { %v2487_v20 = vpop.f32.mrf.mxu3  ;;  %v2439_v34 = vadd.f32 %v2438_v38, %v4827_v56  ;;  %v3717_v56 = vor.u32 %v4449_v43, %v3714_v44 }
 0x1d1   :  { %v2538_v36 = vpop.f32.mrf.mxu0 }
 0x1d2   :  { %v2488_v35 = vadd.f32 %v2487_v20, %v2439_v34 }
 0x1d3   :  { %v2587_v39 = vpop.f32.mrf.mxu1 }
 0x1d4   :  { %v2537_v55 = vadd.f32 %v2536_v25, %v2488_v35 }
 0x1d6   :  { %v4875_v50 = vadd.f32 %v2585_v29, %v2537_v55  ;;  %v3225_v29 = vor.u32 %v4334_v12, %v3224_v11 }
 0x1d7   :  { %v2440_v52 = vpop.f32.mrf.mxu2 }
 0x1d8   :  { %v2489_v53 = vpop.f32.mrf.mxu3  ;;  %v2441_v57 = vadd.f32 %v2440_v52, %v4830_v54  ;;  %v3304_v52 = vld [vmem:[#allocation2 + $0xd0] sm:$0xf] }
 0x1d9   :  { %v2541_v63 = vpop.f32.mrf.mxu0 }
 0x1da   :  { %v2490_v61 = vadd.f32 %v2489_v53, %v2441_v57  ;;  %v4353_v53 = vld [vmem:[#allocation2 + $0x114] sm:$0xf0]  ;;  %v4344_v57 = vld [vmem:[#allocation2 + $0xd4] sm:$0xf] }
 0x1db   :  { %v2590_v26 = vpop.f32.mrf.mxu1 }
 0x1dc   :  { %v2539_v2 = vadd.f32 %v2538_v36, %v2490_v61  ;;  %2638 = vmatmul.bf16.gmra.mxu2 %v3713_v10  ;;  %2736 = vmatmul.bf16.gmra.mxu0 %v3721_v58  ;;  %v3306_v10 = vld [vmem:[#allocation2 + $0x118] sm:$0xf0] }
 0x1dd   :  { %2687 = vmatmul.bf16.gmra.mxu3 %v3717_v56 }
 0x1de   :  { %2785 = vmatmul.bf16.gmra.mxu1 %v3725_v60  ;;  %v4878_v0 = vadd.f32 %v2587_v39, %v2539_v2  ;;  %v3309_v2 = vor.u32 %v4344_v57, %v3306_v10  ;;  %v4379_v57 = vld [vmem:[#allocation2 + $0x1ec] sm:$0xf]  ;;  %v3442_v10 = vld [vmem:[#allocation2 + $0x230] sm:$0xf0] }
 0x1df   :  { %v2443_v3 = vpop.f32.mrf.mxu2 }
 0x1e0   :  { %v2492_v4 = vpop.f32.mrf.mxu3  ;;  %v2444_v6 = vadd.f32 %v2443_v3, %v4833_v32  ;;  %v3229_v32 = vor.u32 %v4325_v14, %v3226_v24 }
 0x1e1   :  { %v2543_v54 = vpop.f32.mrf.mxu0 }
 0x1e2   :  { %v2493_v9 = vadd.f32 %v2492_v4, %v2444_v6 }
 0x1e3   :  { %v2592_v5 = vpop.f32.mrf.mxu1 }
 0x1e4   :  { %v2542_v7 = vadd.f32 %v2541_v63, %v2493_v9  ;;  %v3297_v63 = vor.u32 %v4352_v49, %v3296_v45 }
 0x1e6   :  { %v4881_v22 = vadd.f32 %v2590_v26, %v2542_v7  ;;  %v3305_v26 = vor.u32 %v4353_v53, %v3304_v52  ;;  %v3440_v52 = vld [vmem:[#allocation2 + $0x1e8] sm:$0xf]  ;;  %v4388_v53 = vld [vmem:[#allocation2 + $0x22c] sm:$0xf0] }
 0x1e7   :  { %v2445_v62 = vpop.f32.mrf.mxu2 }
 0x1e8   :  { %v2494_v28 = vpop.f32.mrf.mxu3  ;;  %v2446_v25 = vadd.f32 %v2445_v62, %v4836_v18  ;;  %v3376_v62 = vld [vmem:[#allocation2 + $0x160] sm:$0xf] }
 0x1e9   :  { %v2702_v20 = vpop.f32.mrf.mxu0 }
 0x1ea   :  { %v2495_v38 = vadd.f32 %v2494_v28, %v2446_v25  ;;  %v4371_v28 = vld [vmem:[#allocation2 + $0x1a4] sm:$0xf0]  ;;  %v4362_v25 = vld [vmem:[#allocation2 + $0x164] sm:$0xf] }
 0x1eb   :  { %v2751_v34 = vpop.f32.mrf.mxu1 }
 0x1ec   :  { %v2544_v35 = vadd.f32 %v2543_v54, %v2495_v38  ;;  %2799 = vmatmul.bf16.vlgmr.msra.gmra.mxu2 %v3225_v29  ;;  %2897 = vmatmul.bf16.vlgmr.msra.gmra.mxu0 %v3233_v30  ;;  %v3378_v29 = vld [vmem:[#allocation2 + $0x1a8] sm:$0xf0] }
 0x1ed   :  { %2848 = vmatmul.bf16.vlgmr.msra.gmra.mxu3 %v3229_v32 }
 0x1ee   :  { %2946 = vmatmul.bf16.vlgmr.msra.gmra.mxu1 %v3237_v31  ;;  %v4884_v36 = vadd.f32 %v2592_v5, %v2544_v35  ;;  %v3381_v35 = vor.u32 %v4362_v25, %v3378_v29  ;;  %v4397_v25 = vld [vmem:[#allocation2 + $0x27c] sm:$0xf]  ;;  %v3514_v29 = vld [vmem:[#allocation2 + $0x2c0] sm:$0xf0] }
 0x1ef   :  { %v2604_v39 = vpop.f32.mrf.mxu2 }
 0x1f0   :  { %v2653_v55 = vpop.f32.mrf.mxu3  ;;  %v2605_v42 = vadd.f32 %v2604_v39, %v4839_v8  ;;  %v3301_v8 = vor.u32 %v4343_v37, %v3298_v47 }
 0x1f1   :  { %v2704_v18 = vpop.f32.mrf.mxu0 }
 0x1f2   :  { %v2654_v40 = vadd.f32 %v2653_v55, %v2605_v42 }
 0x1f3   :  { %v2753_v43 = vpop.f32.mrf.mxu1 }
 0x1f4   :  { %v2703_v44 = vadd.f32 %v2702_v20, %v2654_v40  ;;  %v3369_v20 = vor.u32 %v4370_v15, %v3368_v17 }
 0x1f6   :  { %v4887_v56 = vadd.f32 %v2751_v34, %v2703_v44  ;;  %v3377_v34 = vor.u32 %v4371_v28, %v3376_v62  ;;  %v3512_v62 = vld [vmem:[#allocation2 + $0x278] sm:$0xf]  ;;  %v4406_v28 = vld [vmem:[#allocation2 + $0x2bc] sm:$0xf0] }
 0x1f7   :  { %v2606_v58 = vpop.f32.mrf.mxu2 }
 0x1f8   :  { %v2655_v60 = vpop.f32.mrf.mxu3  ;;  %v2607_v61 = vadd.f32 %v2606_v58, %v4842_v46  ;;  %v3448_v58 = vld [vmem:[#allocation2 + $0x1f0] sm:$0xf] }
 0x1f9   :  { %v2707_v4 = vpop.f32.mrf.mxu0 }
 0x1fa   :  { %v2656_v3 = vadd.f32 %v2655_v60, %v2607_v61  ;;  %v4389_v60 = vld [vmem:[#allocation2 + $0x234] sm:$0xf0]  ;;  %v4380_v61 = vld [vmem:[#allocation2 + $0x1f4] sm:$0xf] }
 0x1fb   :  { %v2756_v6 = vpop.f32.mrf.mxu1 }
 0x1fc   :  { %v2705_v9 = vadd.f32 %v2704_v18, %v2656_v3  ;;  %2804 = vmatmul.bf16.gmra.mxu2 %v3297_v63  ;;  %2902 = vmatmul.bf16.gmra.mxu0 %v3305_v26  ;;  %v3450_v63 = vld [vmem:[#allocation2 + $0x238] sm:$0xf0] }
 0x1fd   :  { %2853 = vmatmul.bf16.gmra.mxu3 %v3301_v8 }
 0x1fe   :  { %2951 = vmatmul.bf16.gmra.mxu1 %v3309_v2  ;;  %v4890_v54 = vadd.f32 %v2753_v43, %v2705_v9  ;;  %v3453_v9 = vor.u32 %v4380_v61, %v3450_v63  ;;  %v4415_v61 = vld [vmem:[#allocation2 + $0x30c] sm:$0xf]  ;;  %v3586_v63 = vld [vmem:[#allocation2 + $0x350] sm:$0xf0] }
 0x1ff   :  { %v2609_v5 = vpop.f32.mrf.mxu2 }
 0x200   :  { %v2658_v7 = vpop.f32.mrf.mxu3  ;;  %v2610_v11 = vadd.f32 %v2609_v5, %v4845_v48  ;;  %v3373_v48 = vor.u32 %v4361_v19, %v3370_v21 }
 0x201   :  { %v2709_v46 = vpop.f32.mrf.mxu0 }
 0x202   :  { %v2659_v12 = vadd.f32 %v2658_v7, %v2610_v11 }
 0x203   :  { %v2758_v14 = vpop.f32.mrf.mxu1 }
 0x204   :  { %v2708_v24 = vadd.f32 %v2707_v4, %v2659_v12  ;;  %v3441_v4 = vor.u32 %v4388_v53, %v3440_v52 }
 0x206   :  { %v4893_v32 = vadd.f32 %v2756_v6, %v2708_v24  ;;  %v3449_v6 = vor.u32 %v4389_v60, %v3448_v58  ;;  %v3584_v58 = vld [vmem:[#allocation2 + $0x308] sm:$0xf]  ;;  %v4424_v60 = vld [vmem:[#allocation2 + $0x34c] sm:$0xf0] }
 0x207   :  { %v2611_v30 = vpop.f32.mrf.mxu2 }
 0x208   :  { %v2660_v31 = vpop.f32.mrf.mxu3  ;;  %v2612_v38 = vadd.f32 %v2611_v30, %v4848_v13  ;;  %v3520_v30 = vld [vmem:[#allocation2 + $0x280] sm:$0xf] }
 0x209   :  { %v2712_v55 = vpop.f32.mrf.mxu0 }
 0x20a   :  { %v2661_v39 = vadd.f32 %v2660_v31, %v2612_v38  ;;  %v4407_v31 = vld [vmem:[#allocation2 + $0x2c4] sm:$0xf0]  ;;  %v4398_v38 = vld [vmem:[#allocation2 + $0x284] sm:$0xf] }
 0x20b   :  { %v2761_v42 = vpop.f32.mrf.mxu1 }
 0x20c   :  { %v2710_v40 = vadd.f32 %v2709_v46, %v2661_v39  ;;  %2809 = vmatmul.bf16.gmra.mxu2 %v3369_v20  ;;  %2907 = vmatmul.bf16.gmra.mxu0 %v3377_v34  ;;  %v3522_v20 = vld [vmem:[#allocation2 + $0x2c8] sm:$0xf0] }
 0x20d   :  { %2858 = vmatmul.bf16.gmra.mxu3 %v3373_v48 }
 0x20e   :  { %2956 = vmatmul.bf16.gmra.mxu1 %v3381_v35  ;;  %v4896_v18 = vadd.f32 %v2758_v14, %v2710_v40  ;;  %v3525_v40 = vor.u32 %v4398_v38, %v3522_v20  ;;  %v4433_v38 = vld [vmem:[#allocation2 + $0x39c] sm:$0xf]  ;;  %v3658_v20 = vld [vmem:[#allocation2 + $0x3e0] sm:$0xf0] }
 0x20f   :  { %v2614_v43 = vpop.f32.mrf.mxu2 }
 0x210   :  { %v2663_v44 = vpop.f32.mrf.mxu3  ;;  %v2615_v45 = vadd.f32 %v2614_v43, %v4851_v27  ;;  %v3445_v27 = vor.u32 %v4379_v57, %v3442_v10 }
 0x211   :  { %v2714_v13 = vpop.f32.mrf.mxu0 }
 0x212   :  { %v2664_v49 = vadd.f32 %v2663_v44, %v2615_v45 }
 0x213   :  { %v2763_v37 = vpop.f32.mrf.mxu1 }
 0x214   :  { %v2713_v47 = vadd.f32 %v2712_v55, %v2664_v49  ;;  %v3513_v55 = vor.u32 %v4406_v28, %v3512_v62 }
 0x216   :  { %v4899_v8 = vadd.f32 %v2761_v42, %v2713_v47  ;;  %v3521_v42 = vor.u32 %v4407_v31, %v3520_v30  ;;  %v3656_v30 = vld [vmem:[#allocation2 + $0x398] sm:$0xf]  ;;  %v4442_v31 = vld [vmem:[#allocation2 + $0x3dc] sm:$0xf0] }
 0x217   :  { %v2616_v26 = vpop.f32.mrf.mxu2 }
 0x218   :  { %v2665_v2 = vpop.f32.mrf.mxu3  ;;  %v2617_v3 = vadd.f32 %v2616_v26, %v4854_v59  ;;  %v3592_v26 = vld [vmem:[#allocation2 + $0x310] sm:$0xf] }
 0x219   :  { %v2717_v7 = vpop.f32.mrf.mxu0 }
 0x21a   :  { %v2666_v5 = vadd.f32 %v2665_v2, %v2617_v3  ;;  %v4425_v2 = vld [vmem:[#allocation2 + $0x354] sm:$0xf0]  ;;  %v4416_v3 = vld [vmem:[#allocation2 + $0x314] sm:$0xf] }
 0x21b   :  { %v2766_v11 = vpop.f32.mrf.mxu1 }
 0x21c   :  { %v2715_v12 = vadd.f32 %v2714_v13, %v2666_v5  ;;  %2814 = vmatmul.bf16.gmra.mxu2 %v3441_v4  ;;  %2912 = vmatmul.bf16.gmra.mxu0 %v3449_v6  ;;  %v3594_v4 = vld [vmem:[#allocation2 + $0x358] sm:$0xf0] }
 0x21d   :  { %2863 = vmatmul.bf16.gmra.mxu3 %v3445_v27 }
 0x21e   :  { %2961 = vmatmul.bf16.gmra.mxu1 %v3453_v9  ;;  %v4902_v46 = vadd.f32 %v2763_v37, %v2715_v12  ;;  %v3597_v12 = vor.u32 %v4416_v3, %v3594_v4  ;;  %v4451_v3 = vld [vmem:[#allocation2 + $0x42c] sm:$0xf]  ;;  %v3730_v4 = vld [vmem:[#allocation2 + $0x470] sm:$0xf0] }
 0x21f   :  { %v2619_v14 = vpop.f32.mrf.mxu2 }
 0x220   :  { %v2668_v24 = vpop.f32.mrf.mxu3  ;;  %v2620_v17 = vadd.f32 %v2619_v14, %v4857_v1  ;;  %v3517_v1 = vor.u32 %v4397_v25, %v3514_v29 }
 0x221   :  { %v2719_v59 = vpop.f32.mrf.mxu0 }
 0x222   :  { %v2669_v15 = vadd.f32 %v2668_v24, %v2620_v17 }
 0x223   :  { %v2768_v19 = vpop.f32.mrf.mxu1 }
 0x224   :  { %v2718_v21 = vadd.f32 %v2717_v7, %v2669_v15  ;;  %v3585_v7 = vor.u32 %v4424_v60, %v3584_v58 }
 0x226   :  { %v4905_v48 = vadd.f32 %v2766_v11, %v2718_v21  ;;  %v3593_v11 = vor.u32 %v4425_v2, %v3592_v26  ;;  %v3728_v26 = vld [vmem:[#allocation2 + $0x428] sm:$0xf]  ;;  %v4460_v2 = vld [vmem:[#allocation2 + $0x46c] sm:$0xf0] }
 0x227   :  { %v2621_v34 = vpop.f32.mrf.mxu2 }
 0x228   :  { %v2670_v35 = vpop.f32.mrf.mxu3  ;;  %v2622_v39 = vadd.f32 %v2621_v34, %v4860_v23  ;;  %v3664_v34 = vld [vmem:[#allocation2 + $0x3a0] sm:$0xf] }
 0x229   :  { %v2722_v44 = vpop.f32.mrf.mxu0 }
 0x22a   :  { %v2671_v43 = vadd.f32 %v2670_v35, %v2622_v39  ;;  %v4443_v35 = vld [vmem:[#allocation2 + $0x3e4] sm:$0xf0]  ;;  %v4434_v39 = vld [vmem:[#allocation2 + $0x3a4] sm:$0xf] }
 0x22b   :  { %v2771_v45 = vpop.f32.mrf.mxu1 }
 0x22c   :  { %v2720_v49 = vadd.f32 %v2719_v59, %v2671_v43  ;;  %2819 = vmatmul.bf16.gmra.mxu2 %v3513_v55  ;;  %2917 = vmatmul.bf16.gmra.mxu0 %v3521_v42  ;;  %v3666_v55 = vld [vmem:[#allocation2 + $0x3e8] sm:$0xf0] }
 0x22d   :  { %2868 = vmatmul.bf16.gmra.mxu3 %v3517_v1 }
 0x22e   :  { %2966 = vmatmul.bf16.gmra.mxu1 %v3525_v40  ;;  %v4908_v13 = vadd.f32 %v2768_v19, %v2720_v49  ;;  %v3669_v49 = vor.u32 %v4434_v39, %v3666_v55 }
 0x22f   :  { %v2624_v37 = vpop.f32.mrf.mxu2 }
 0x230   :  { %v2673_v47 = vpop.f32.mrf.mxu3  ;;  %v2625_v52 = vadd.f32 %v2624_v37, %v4863_v41  ;;  %v3589_v41 = vor.u32 %v4415_v61, %v3586_v63 }
 0x231   :  { %v2724_v23 = vpop.f32.mrf.mxu0 }
 0x232   :  { %v2674_v53 = vadd.f32 %v2673_v47, %v2625_v52 }
 0x233   :  { %v2773_v57 = vpop.f32.mrf.mxu1 }
 0x234   :  { %v2723_v10 = vadd.f32 %v2722_v44, %v2674_v53  ;;  %v3657_v44 = vor.u32 %v4442_v31, %v3656_v30 }
 0x236   :  { %v4911_v27 = vadd.f32 %v2771_v45, %v2723_v10  ;;  %v3665_v45 = vor.u32 %v4443_v35, %v3664_v34 }
 0x237   :  { %v2626_v6 = vpop.f32.mrf.mxu2 }
 0x238   :  { %v2675_v9 = vpop.f32.mrf.mxu3  ;;  %v2627_v5 = vadd.f32 %v2626_v6, %v4866_v51  ;;  %v3736_v6 = vld [vmem:[#allocation2 + $0x430] sm:$0xf] }
 0x239   :  { %v2727_v24 = vpop.f32.mrf.mxu0 }
 0x23a   :  { %v2676_v14 = vadd.f32 %v2675_v9, %v2627_v5  ;;  %v4461_v9 = vld [vmem:[#allocation2 + $0x474] sm:$0xf0]  ;;  %v4452_v5 = vld [vmem:[#allocation2 + $0x434] sm:$0xf] }
 0x23b   :  { %v2776_v17 = vpop.f32.mrf.mxu1 }
 0x23c   :  { %v2725_v15 = vadd.f32 %v2724_v23, %v2676_v14  ;;  %2824 = vmatmul.bf16.gmra.mxu2 %v3585_v7  ;;  %2922 = vmatmul.bf16.gmra.mxu0 %v3593_v11  ;;  %v3738_v7 = vld [vmem:[#allocation2 + $0x478] sm:$0xf0] }
 0x23d   :  { %2873 = vmatmul.bf16.gmra.mxu3 %v3589_v41 }
 0x23e   :  { %2971 = vmatmul.bf16.gmra.mxu1 %v3597_v12  ;;  %v4914_v59 = vadd.f32 %v2773_v57, %v2725_v15  ;;  %v3741_v15 = vor.u32 %v4452_v5, %v3738_v7 }
 0x23f   :  { %v2629_v19 = vpop.f32.mrf.mxu2 }
 0x240   :  { %v2678_v21 = vpop.f32.mrf.mxu3  ;;  %v2630_v62 = vadd.f32 %v2629_v19, %v4869_v16  ;;  %v3661_v16 = vor.u32 %v4433_v38, %v3658_v20 }
 0x241   :  { %v2729_v51 = vpop.f32.mrf.mxu0 }
 0x242   :  { %v2679_v28 = vadd.f32 %v2678_v21, %v2630_v62 }
 0x243   :  { %v2778_v25 = vpop.f32.mrf.mxu1 }
 0x244   :  { %v2728_v29 = vadd.f32 %v2727_v24, %v2679_v28  ;;  %v3729_v24 = vor.u32 %v4460_v2, %v3728_v26 }
 0x246   :  { %v4917_v1 = vadd.f32 %v2776_v17, %v2728_v29  ;;  %v3737_v17 = vor.u32 %v4461_v9, %v3736_v6 }
 0x247   :  { %v2631_v42 = vpop.f32.mrf.mxu2 }
 0x248   :  { %v2680_v40 = vpop.f32.mrf.mxu3  ;;  %v2632_v43 = vadd.f32 %v2631_v42, %v4872_v33 }
 0x249   :  { %v2732_v47 = vpop.f32.mrf.mxu0 }
 0x24a   :  { %v2681_v37 = vadd.f32 %v2680_v40, %v2632_v43 }
 0x24b   :  { %v2781_v52 = vpop.f32.mrf.mxu1 }
 0x24c   :  { %v2730_v53 = vadd.f32 %v2729_v51, %v2681_v37  ;;  %2829 = vmatmul.bf16.gmra.mxu2 %v3657_v44  ;;  %2927 = vmatmul.bf16.gmra.mxu0 %v3665_v45 }
 0x24d   :  { %2878 = vmatmul.bf16.gmra.mxu3 %v3661_v16 }
 0x24e   :  { %2976 = vmatmul.bf16.gmra.mxu1 %v3669_v49  ;;  %v4920_v23 = vadd.f32 %v2778_v25, %v2730_v53 }
 0x24f   :  { %v2634_v57 = vpop.f32.mrf.mxu2 }
 0x250   :  { %v2683_v10 = vpop.f32.mrf.mxu3  ;;  %v2635_v58 = vadd.f32 %v2634_v57, %v4875_v50  ;;  %v3733_v50 = vor.u32 %v4451_v3, %v3730_v4 }
 0x251   :  { %v2734_v33 = vpop.f32.mrf.mxu0 }
 0x252   :  { %v2684_v60 = vadd.f32 %v2683_v10, %v2635_v58  ;;  %v4938_v10 = vld [vmem:[%s5018_s2] ss:$0 sm:$0xff]  ;;  %s4719_s2 = smov [#allocation7]  }
 0x253   :  { %v2783_v61 = vpop.f32.mrf.mxu1 }
 0x254   :  { %v2733_v63 = vadd.f32 %v2732_v47, %v2684_v60  ;;  %v4943_v60 = vld [vmem:[%s5019_s3] ss:$0 sm:$0xff]  ;;  %s3150_s3 = sshll.u32 %s4719_s2, 4  ;;  %s3151_s3 = int_to_ptr.vmem [resolvable:$true] %s3150_s3 }
 0x256   :  { %v4923_v41 = vadd.f32 %v2781_v52, %v2733_v63 }
 0x257   :  { %v2636_v11 = vpop.f32.mrf.mxu2 }
 0x258   :  { %v2685_v12 = vpop.f32.mrf.mxu3  ;;  %v2637_v14 = vadd.f32 %v2636_v11, %v4878_v0 }
 0x259   :  { %v2737_v21 = vpop.f32.mrf.mxu0 }
 0x25a   :  { %v2686_v19 = vadd.f32 %v2685_v12, %v2637_v14 }
 0x25b   :  { %v2786_v62 = vpop.f32.mrf.mxu1 }
 0x25c   :  { %v2735_v28 = vadd.f32 %v2734_v33, %v2686_v19  ;;  %2834 = vmatmul.bf16.gmra.mxu2 %v3729_v24  ;;  %2932 = vmatmul.bf16.gmra.mxu0 %v3737_v17 }
 0x25d   :  { %2883 = vmatmul.bf16.gmra.mxu3 %v3733_v50 }
 0x25e   :  { %2981 = vmatmul.bf16.gmra.mxu1 %v3741_v15  ;;  %v4926_v51 = vadd.f32 %v2783_v61, %v2735_v28  ;;  %v4950_v61 = vld [vmem:[%s5020_s4] ss:$0 sm:$0xff] }
 0x25f   :  { %v2639_v25 = vpop.f32.mrf.mxu2 }
 0x260   :  { %v2688_v29 = vpop.f32.mrf.mxu3  ;;  %v2640_v30 = vadd.f32 %v2639_v25, %v4881_v22 }
 0x261   :  { %v2739_v0 = vpop.f32.mrf.mxu0 }
 0x262   :  { %v2689_v31 = vadd.f32 %v2688_v29, %v2640_v30 }
 0x263   :  { %v2788_v38 = vpop.f32.mrf.mxu1 }
 0x264   :  { %v2738_v20 = vadd.f32 %v2737_v21, %v2689_v31 }
 0x266   :  { %v4929_v34 = vadd.f32 %v2786_v62, %v2738_v20 }
 0x267   :  { %v2641_v35 = vpop.f32.mrf.mxu2 }
 0x268   :  { %v2690_v39 = vpop.f32.mrf.mxu3  ;;  %v2642_v55 = vadd.f32 %v2641_v35, %v4884_v36 }
 0x269   :  { %v2898_v40 = vpop.f32.mrf.mxu0 }
 0x26a   :  { %v2691_v42 = vadd.f32 %v2690_v39, %v2642_v55 }
 0x26b   :  { %v2947_v43 = vpop.f32.mrf.mxu1 }
 0x26c   :  { %v2740_v44 = vadd.f32 %v2739_v0, %v2691_v42 }
 0x26e   :  { %v4932_v16 = vadd.f32 %v2788_v38, %v2740_v44 }
 0x26f   :  { %v2800_v45 = vpop.f32.mrf.mxu2 }
 0x270   :  { %v2849_v49 = vpop.f32.mrf.mxu3  ;;  %v2801_v22 = vadd.f32 %v2800_v45, %v4887_v56 }
 0x271   :  { %v2900_v47 = vpop.f32.mrf.mxu0 }
 0x272   :  { %v2850_v37 = vadd.f32 %v2849_v49, %v2801_v22 }
 0x273   :  { %v2949_v52 = vpop.f32.mrf.mxu1 }
 0x274   :  { %v2899_v53 = vadd.f32 %v2898_v40, %v2850_v37 }
 0x276   :  { %v2948_v57 = vadd.f32 %v2947_v43, %v2899_v53 }
 0x277   :  { %v2802_v36 = vpop.f32.mrf.mxu2 }
 0x278   :  { %v2851_v58 = vpop.f32.mrf.mxu3  ;;  %v2803_v33 = vadd.f32 %v2802_v36, %v4890_v54  ;;  %v3042_v56 = vmul.f32 %v4938_v10, %v2948_v57 }
 0x279   :  { %v2903_v26 = vpop.f32.mrf.mxu0 }
 0x27a   :  { %v2852_v63 = vadd.f32 %v2851_v58, %v2803_v33  ;;  %v3062_v3 = vadd.f32 %v4943_v60, %v3042_v56 }
 0x27b   :  { %v2952_v2 = vpop.f32.mrf.mxu1 }
 0x27c   :  { %v2901_v4 = vadd.f32 %v2900_v47, %v2852_v63  ;;  %vm3078_vm0 = vcmp.ge.f32.partialorder %v3062_v3, 0.0  ;;  %v3098_v6 = vmul.f32 %v4950_v61, %v3062_v3 }
 0x27e   :  { %v2950_v9 = vadd.f32 %v2949_v52, %v2901_v4  ;;  %v3114_v54 = vsel %vm3078_vm0, %v3062_v3, %v3098_v6 }
 0x27f   :  { %v2805_v5 = vpop.f32.mrf.mxu2  ;;  %3130 = vst [vmem:[#allocation7] sm:$0xff] %v3114_v54 }
 0x280   :  { %v2854_v7 = vpop.f32.mrf.mxu3  ;;  %v2806_v11 = vadd.f32 %v2805_v5, %v4893_v32  ;;  %v3043_v12 = vmul.f32 %v4938_v10, %v2950_v9 }
 0x281   :  { %v2905_v24 = vpop.f32.mrf.mxu0 }
 0x282   :  { %v2855_v14 = vadd.f32 %v2854_v7, %v2806_v11  ;;  %v3063_v17 = vadd.f32 %v4943_v60, %v3043_v12 }
 0x283   :  { %v2954_v50 = vpop.f32.mrf.mxu1 }
 0x284   :  { %v2904_v15 = vadd.f32 %v2903_v26, %v2855_v14  ;;  %vm3079_vm1 = vcmp.ge.f32.partialorder %v3063_v17, 0.0  ;;  %v3099_v19 = vmul.f32 %v4950_v61, %v3063_v17 }
 0x286   :  { %v2953_v21 = vadd.f32 %v2952_v2, %v2904_v15  ;;  %v3115_v25 = vsel %vm3079_vm1, %v3063_v17, %v3099_v19 }
 0x287   :  { %v2807_v62 = vpop.f32.mrf.mxu2  ;;  %3131 = vst [vmem:[#allocation7 + $0x8] sm:$0xff] %v3115_v25 }
 0x288   :  { %v2856_v28 = vpop.f32.mrf.mxu3  ;;  %v2808_v29 = vadd.f32 %v2807_v62, %v4896_v18  ;;  %v3044_v32 = vmul.f32 %v4938_v10, %v2953_v21 }
 0x289   :  { %v2908_v31 = vpop.f32.mrf.mxu0 }
 0x28a   :  { %v2857_v30 = vadd.f32 %v2856_v28, %v2808_v29  ;;  %v3064_v38 = vadd.f32 %v4943_v60, %v3044_v32 }
 0x28b   :  { %v2957_v0 = vpop.f32.mrf.mxu1 }
 0x28c   :  { %v2906_v20 = vadd.f32 %v2905_v24, %v2857_v30  ;;  %vm3080_vm2 = vcmp.ge.f32.partialorder %v3064_v38, 0.0  ;;  %v3100_v35 = vmul.f32 %v4950_v61, %v3064_v38 }
 0x28e   :  { %v2955_v39 = vadd.f32 %v2954_v50, %v2906_v20  ;;  %v3116_v40 = vsel %vm3080_vm2, %v3064_v38, %v3100_v35 }
 0x28f   :  { %v2810_v55 = vpop.f32.mrf.mxu2  ;;  %3132 = vst [vmem:[#allocation7 + $0x10] sm:$0xff] %v3116_v40 }
 0x290   :  { %v2859_v42 = vpop.f32.mrf.mxu3  ;;  %v2811_v43 = vadd.f32 %v2810_v55, %v4899_v8  ;;  %v3045_v18 = vmul.f32 %v4938_v10, %v2955_v39 }
 0x291   :  { %v2910_v45 = vpop.f32.mrf.mxu0 }
 0x292   :  { %v2860_v44 = vadd.f32 %v2859_v42, %v2811_v43  ;;  %v3065_v22 = vadd.f32 %v4943_v60, %v3045_v18 }
 0x293   :  { %v2959_v49 = vpop.f32.mrf.mxu1 }
 0x294   :  { %v2909_v37 = vadd.f32 %v2908_v31, %v2860_v44  ;;  %vm3081_vm3 = vcmp.ge.f32.partialorder %v3065_v22, 0.0  ;;  %v3101_v47 = vmul.f32 %v4950_v61, %v3065_v22 }
 0x296   :  { %v2958_v52 = vadd.f32 %v2957_v0, %v2909_v37  ;;  %v3117_v36 = vsel %vm3081_vm3, %v3065_v22, %v3101_v47 }
 0x297   :  { %v2812_v53 = vpop.f32.mrf.mxu2  ;;  %3133 = vst [vmem:[#allocation7 + $0x18] sm:$0xff] %v3117_v36 }
 0x298   :  { %v2861_v57 = vpop.f32.mrf.mxu3  ;;  %v2813_v58 = vadd.f32 %v2812_v53, %v4902_v46  ;;  %v3046_v8 = vmul.f32 %v4938_v10, %v2958_v52 }
 0x299   :  { %v2913_v56 = vpop.f32.mrf.mxu0 }
 0x29a   :  { %v2862_v33 = vadd.f32 %v2861_v57, %v2813_v58  ;;  %v3066_v26 = vadd.f32 %v4943_v60, %v3046_v8 }
 0x29b   :  { %v2962_v63 = vpop.f32.mrf.mxu1 }
 0x29c   :  { %v2911_v2 = vadd.f32 %v2910_v45, %v2862_v33  ;;  %vm3082_vm4 = vcmp.ge.f32.partialorder %v3066_v26, 0.0  ;;  %v3102_v3 = vmul.f32 %v4950_v61, %v3066_v26 }
 0x29e   :  { %v2960_v4 = vadd.f32 %v2959_v49, %v2911_v2  ;;  %v3118_v5 = vsel %vm3082_vm4, %v3066_v26, %v3102_v3 }
 0x29f   :  { %v2815_v6 = vpop.f32.mrf.mxu2  ;;  %3134 = vst [vmem:[#allocation7 + $0x20] sm:$0xff] %v3118_v5 }
 0x2a0   :  { %v2864_v9 = vpop.f32.mrf.mxu3  ;;  %v2816_v7 = vadd.f32 %v2815_v6, %v4905_v48  ;;  %v3047_v46 = vmul.f32 %v4938_v10, %v2960_v4 }
 0x2a1   :  { %v2915_v11 = vpop.f32.mrf.mxu0 }
 0x2a2   :  { %v2865_v54 = vadd.f32 %v2864_v9, %v2816_v7  ;;  %v3067_v14 = vadd.f32 %v4943_v60, %v3047_v46 }
 0x2a3   :  { %v2964_v12 = vpop.f32.mrf.mxu1 }
 0x2a4   :  { %v2914_v24 = vadd.f32 %v2913_v56, %v2865_v54  ;;  %vm3083_vm5 = vcmp.ge.f32.partialorder %v3067_v14, 0.0  ;;  %v3103_v50 = vmul.f32 %v4950_v61, %v3067_v14 }
 0x2a6   :  { %v2963_v17 = vadd.f32 %v2962_v63, %v2914_v24  ;;  %v3119_v21 = vsel %vm3083_vm5, %v3067_v14, %v3103_v50 }
 0x2a7   :  { %v2817_v15 = vpop.f32.mrf.mxu2  ;;  %3135 = vst [vmem:[#allocation7 + $0x28] sm:$0xff] %v3119_v21 }
 0x2a8   :  { %v2866_v19 = vpop.f32.mrf.mxu3  ;;  %v2818_v62 = vadd.f32 %v2817_v15, %v4908_v13  ;;  %v3048_v48 = vmul.f32 %v4938_v10, %v2963_v17 }
 0x2a9   :  { %v2918_v25 = vpop.f32.mrf.mxu0 }
 0x2aa   :  { %v2867_v28 = vadd.f32 %v2866_v19, %v2818_v62  ;;  %v3068_v32 = vadd.f32 %v4943_v60, %v3048_v48 }
 0x2ab   :  { %v2967_v29 = vpop.f32.mrf.mxu1 }
 0x2ac   :  { %v2916_v30 = vadd.f32 %v2915_v11, %v2867_v28  ;;  %vm3084_vm6 = vcmp.ge.f32.partialorder %v3068_v32, 0.0  ;;  %v3104_v31 = vmul.f32 %v4950_v61, %v3068_v32 }
 0x2ae   :  { %v2965_v0 = vadd.f32 %v2964_v12, %v2916_v30  ;;  %v3120_v35 = vsel %vm3084_vm6, %v3068_v32, %v3104_v31 }
 0x2af   :  { %v2820_v38 = vpop.f32.mrf.mxu2  ;;  %3136 = vst [vmem:[#allocation7 + $0x30] sm:$0xff] %v3120_v35 }
 0x2b0   :  { %v2869_v20 = vpop.f32.mrf.mxu3  ;;  %v2821_v39 = vadd.f32 %v2820_v38, %v4911_v27  ;;  %v3049_v13 = vmul.f32 %v4938_v10, %v2965_v0 }
 0x2b1   :  { %v2920_v42 = vpop.f32.mrf.mxu0 }
 0x2b2   :  { %v2870_v55 = vadd.f32 %v2869_v20, %v2821_v39  ;;  %v3069_v43 = vadd.f32 %v4943_v60, %v3049_v13 }
 0x2b3   :  { %v2969_v40 = vpop.f32.mrf.mxu1 }
 0x2b4   :  { %v2919_v18 = vadd.f32 %v2918_v25, %v2870_v55  ;;  %vm3085_vm7 = vcmp.ge.f32.partialorder %v3069_v43, 0.0  ;;  %v3105_v44 = vmul.f32 %v4950_v61, %v3069_v43 }
 0x2b6   :  { %v2968_v45 = vadd.f32 %v2967_v29, %v2919_v18  ;;  %v3121_v37 = vsel %vm3085_vm7, %v3069_v43, %v3105_v44 }
 0x2b7   :  { %v2822_v49 = vpop.f32.mrf.mxu2  ;;  %3137 = vst [vmem:[#allocation7 + $0x38] sm:$0xff] %v3121_v37 }
 0x2b8   :  { %v2871_v22 = vpop.f32.mrf.mxu3  ;;  %v2823_v47 = vadd.f32 %v2822_v49, %v4914_v59  ;;  %v3050_v27 = vmul.f32 %v4938_v10, %v2968_v45 }
 0x2b9   :  { %v2923_v53 = vpop.f32.mrf.mxu0 }
 0x2ba   :  { %v2872_v52 = vadd.f32 %v2871_v22, %v2823_v47  ;;  %v3070_v36 = vadd.f32 %v4943_v60, %v3050_v27 }
 0x2bb   :  { %v2972_v57 = vpop.f32.mrf.mxu1 }
 0x2bc   :  { %v2921_v58 = vadd.f32 %v2920_v42, %v2872_v52  ;;  %vm3086_vm8 = vcmp.ge.f32.partialorder %v3070_v36, 0.0  ;;  %v3106_v8 = vmul.f32 %v4950_v61, %v3070_v36 }
 0x2be   :  { %v2970_v33 = vadd.f32 %v2969_v40, %v2921_v58  ;;  %v3122_v26 = vsel %vm3086_vm8, %v3070_v36, %v3106_v8 }
 0x2bf   :  { %v2825_v56 = vpop.f32.mrf.mxu2  ;;  %3138 = vst [vmem:[#allocation7 + $0x40] sm:$0xff] %v3122_v26 }
 0x2c0   :  { %v2874_v63 = vpop.f32.mrf.mxu3  ;;  %v2826_v2 = vadd.f32 %v2825_v56, %v4917_v1  ;;  %v3051_v59 = vmul.f32 %v4938_v10, %v2970_v33 }
 0x2c1   :  { %v2925_v4 = vpop.f32.mrf.mxu0 }
 0x2c2   :  { %v2875_v3 = vadd.f32 %v2874_v63, %v2826_v2  ;;  %v3071_v6 = vadd.f32 %v4943_v60, %v3051_v59 }
 0x2c3   :  { %v2974_v5 = vpop.f32.mrf.mxu1 }
 0x2c4   :  { %v2924_v9 = vadd.f32 %v2923_v53, %v2875_v3  ;;  %vm3087_vm9 = vcmp.ge.f32.partialorder %v3071_v6, 0.0  ;;  %v3107_v7 = vmul.f32 %v4950_v61, %v3071_v6 }
 0x2c6   :  { %v2973_v46 = vadd.f32 %v2972_v57, %v2924_v9  ;;  %v3123_v12 = vsel %vm3087_vm9, %v3071_v6, %v3107_v7 }
 0x2c7   :  { %v2827_v54 = vpop.f32.mrf.mxu2  ;;  %3139 = vst [vmem:[#allocation7 + $0x48] sm:$0xff] %v3123_v12 }
 0x2c8   :  { %v2876_v11 = vpop.f32.mrf.mxu3  ;;  %v2828_v14 = vadd.f32 %v2827_v54, %v4920_v23  ;;  %v3052_v1 = vmul.f32 %v4938_v10, %v2973_v46 }
 0x2c9   :  { %v2928_v15 = vpop.f32.mrf.mxu0 }
 0x2ca   :  { %v2877_v24 = vadd.f32 %v2876_v11, %v2828_v14  ;;  %v3072_v50 = vadd.f32 %v4943_v60, %v3052_v1 }
 0x2cb   :  { %v2977_v62 = vpop.f32.mrf.mxu1 }
 0x2cc   :  { %v2926_v17 = vadd.f32 %v2925_v4, %v2877_v24  ;;  %vm3088_vm10 = vcmp.ge.f32.partialorder %v3072_v50, 0.0  ;;  %v3108_v19 = vmul.f32 %v4950_v61, %v3072_v50 }
 0x2ce   :  { %v2975_v21 = vadd.f32 %v2974_v5, %v2926_v17  ;;  %v3124_v25 = vsel %vm3088_vm10, %v3072_v50, %v3108_v19 }
 0x2cf   :  { %v2830_v48 = vpop.f32.mrf.mxu2  ;;  %3140 = vst [vmem:[#allocation7 + $0x50] sm:$0xff] %v3124_v25 }
 0x2d0   :  { %v2879_v28 = vpop.f32.mrf.mxu3  ;;  %v2831_v29 = vadd.f32 %v2830_v48, %v4923_v41  ;;  %v3053_v23 = vmul.f32 %v4938_v10, %v2975_v21 }
 0x2d1   :  { %v2930_v20 = vpop.f32.mrf.mxu0 }
 0x2d2   :  { %v2880_v32 = vadd.f32 %v2879_v28, %v2831_v29  ;;  %v3073_v30 = vadd.f32 %v4943_v60, %v3053_v23 }
 0x2d3   :  { %v2979_v42 = vpop.f32.mrf.mxu1 }
 0x2d4   :  { %v2929_v31 = vadd.f32 %v2928_v15, %v2880_v32  ;;  %vm3089_vm11 = vcmp.ge.f32.partialorder %v3073_v30, 0.0  ;;  %v3109_v0 = vmul.f32 %v4950_v61, %v3073_v30 }
 0x2d6   :  { %v2978_v38 = vadd.f32 %v2977_v62, %v2929_v31  ;;  %v3125_v13 = vsel %vm3089_vm11, %v3073_v30, %v3109_v0 }
 0x2d7   :  { %v2832_v35 = vpop.f32.mrf.mxu2  ;;  %3141 = vst [vmem:[#allocation7 + $0x58] sm:$0xff] %v3125_v13 }
 0x2d8   :  { %v2881_v39 = vpop.f32.mrf.mxu3  ;;  %v2833_v55 = vadd.f32 %v2832_v35, %v4926_v51  ;;  %v3054_v41 = vmul.f32 %v4938_v10, %v2978_v38 }
 0x2d9   :  { %v2933_v27 = vpop.f32.mrf.mxu0 }
 0x2da   :  { %v2882_v40 = vadd.f32 %v2881_v39, %v2833_v55  ;;  %v3074_v43 = vadd.f32 %v4943_v60, %v3054_v41 }
 0x2db   :  { %v2982_v53 = vpop.f32.mrf.mxu1 }
 0x2dc   :  { %v2931_v18 = vadd.f32 %v2930_v20, %v2882_v40  ;;  %vm3090_vm12 = vcmp.ge.f32.partialorder %v3074_v43, 0.0  ;;  %v3110_v44 = vmul.f32 %v4950_v61, %v3074_v43 }
 0x2de   :  { %v2980_v45 = vadd.f32 %v2979_v42, %v2931_v18  ;;  %v3126_v37 = vsel %vm3090_vm12, %v3074_v43, %v3110_v44 }
 0x2df   :  { %v2835_v49 = vpop.f32.mrf.mxu2  ;;  %3142 = vst [vmem:[#allocation7 + $0x60] sm:$0xff] %v3126_v37 }
 0x2e0   :  { %v2884_v22 = vpop.f32.mrf.mxu3  ;;  %v2836_v47 = vadd.f32 %v2835_v49, %v4929_v34  ;;  %v3055_v51 = vmul.f32 %v4938_v10, %v2980_v45 }
 0x2e1   :  { %v2935_v59 = vpop.f32.mrf.mxu0 }
 0x2e2   :  { %v2885_v52 = vadd.f32 %v2884_v22, %v2836_v47  ;;  %v3075_v57 = vadd.f32 %v4943_v60, %v3055_v51 }
 0x2e3   :  { %v2984_v6 = vpop.f32.mrf.mxu1 }
 0x2e4   :  { %v2934_v36 = vadd.f32 %v2933_v27, %v2885_v52  ;;  %vm3091_vm13 = vcmp.ge.f32.partialorder %v3075_v57, 0.0  ;;  %v3111_v58 = vmul.f32 %v4950_v61, %v3075_v57 }
 0x2e6   :  { %v2983_v8 = vadd.f32 %v2982_v53, %v2934_v36  ;;  %v3127_v56 = vsel %vm3091_vm13, %v3075_v57, %v3111_v58 }
 0x2e7   :  { %v2837_v33 = vpop.f32.mrf.mxu2  ;;  %3143 = vst [vmem:[#allocation7 + $0x68] sm:$0xff] %v3127_v56 }
 0x2e8   :  { %v2838_v63 = vadd.f32 %v2837_v33, %v4932_v16  ;;  %v2886_v26 = vpop.f32.mrf.mxu3  ;;  %v3056_v34 = vmul.f32 %v4938_v10, %v2983_v8 }
 0x2ea   :  { %v2887_v2 = vadd.f32 %v2886_v26, %v2838_v63  ;;  %v3076_v3 = vadd.f32 %v4943_v60, %v3056_v34 }
 0x2ec   :  { %v2936_v4 = vadd.f32 %v2935_v59, %v2887_v2  ;;  %vm3092_vm14 = vcmp.ge.f32.partialorder %v3076_v3, 0.0  ;;  %v3112_v9 = vmul.f32 %v4950_v61, %v3076_v3 }
 0x2ee   :  { %v2985_v5 = vadd.f32 %v2984_v6, %v2936_v4  ;;  %v3128_v7 = vsel %vm3092_vm14, %v3076_v3, %v3112_v9 }
 0x2ef   :  { %3144 = vst [vmem:[#allocation7 + $0x70] sm:$0xff] %v3128_v7 }
 0x2f0   :  { %v3057_v46 = vmul.f32 %v4938_v10, %v2985_v5 }
 0x2f2   :  { %v3077_v16 = vadd.f32 %v4943_v60, %v3057_v46 }
 0x2f4   :  { %vm3093_vm15 = vcmp.ge.f32.partialorder %v3077_v16, 0.0  ;;  %v3113_v54 = vmul.f32 %v4950_v61, %v3077_v16 }
 0x2f6   :  { %v3129_v11 = vsel %vm3093_vm15, %v3077_v16, %v3113_v54 }
 0x2f7   :  { %3145 = vst [vmem:[#allocation7 + $0x78] sm:$0xff] %v3129_v11 }
 0x2f8   :  { %3158 = dma.vmem_to_hbm [thread:$0]  %s3151_s3, 2048, %s3153_s12, [#allocation4], %s4720_s13, %s4720_s13, %s4721_s14  }
 0x2f9   :  { %4711 = dma.done.wait [#allocation4], 2048  }
 0x2fa   :  { %4712 = vsyncadd [#allocation4], 4294965248 }
 0x2fb   :  { %3163 = vsyncpa [#allocation3], 1 }
 0x2fc   :  { %3164 = vsyncpa [#allocation6], 1 }
 0x2fd   :  { %3165 = vsyncpa [#allocation4], 1 }

</bundles_post_ra>
